<compile_context>
chip_gen: v6e
topology: v6e:2x2x1
jax: 0.10.0
libtpu: 0.0.40
codegen_flags: <defaults>
</compile_context>

<pallas_src>
import jax
import jax.numpy as jnp
from jax.experimental import pallas as pl
from jax.experimental.pallas import tpu as pltpu


def _dwt_kernel(x_ref, o_ref):
    """x_ref: (1, Cb, H, W) -> o_ref: (1, 4, Cb, H//2, W//2) = [LL, HL, LH, HH]."""
    _, cb, h, w = x_ref.shape
    ho, wo = h // 2, w // 2

    # Do the arithmetic in f32 regardless of input dtype (matches ref /2 scaling).
    x = x_ref[0].astype(jnp.float32) * 0.5                     # (Cb, H, W)

    # Column butterfly first: a single lane de-interleave of x (2 extracts),
    # instead of 4 per-subband lane-strided extracts.
    xc = x.reshape(cb, h, wo, 2)
    ce = xc[..., 0]                                            # even columns (Cb, H, Wo)
    co = xc[..., 1]                                            # odd  columns (Cb, H, Wo)
    cs = ce + co                                               # column pair sum
    cd = co - ce                                               # column pair diff

    # Row butterfly: sublane split (cheap) on the already column-reduced data.
    csr = cs.reshape(cb, ho, 2, wo)
    cdr = cd.reshape(cb, ho, 2, wo)
    ll = csr[:, :, 0] + csr[:, :, 1]                           #  x1 + x2 + x3 + x4
    lh = csr[:, :, 1] - csr[:, :, 0]                           # -x1 + x2 - x3 + x4
    hl = cdr[:, :, 0] + cdr[:, :, 1]                           # -x1 - x2 + x3 + x4
    hh = cdr[:, :, 1] - cdr[:, :, 0]                           #  x1 - x2 - x3 + x4

    dt = o_ref.dtype
    o_ref[0, 0] = ll.astype(dt)
    o_ref[0, 1] = hl.astype(dt)
    o_ref[0, 2] = lh.astype(dt)
    o_ref[0, 3] = hh.astype(dt)


def _pick_channel_block(c, h, w, itemsize, budget_bytes=8 * 1024 * 1024):
    """Largest divisor of C whose (Cb, H, W) input block stays under budget_bytes.

    With the output block the same total size and double-buffering, total VMEM
    is ~4x this budget (<= ~32 MiB), safe on v5e/v6e/v7x.
    """
    plane_bytes = h * w * itemsize
    max_cb = max(1, budget_bytes // plane_bytes)
    cb = 1
    for d in range(1, c + 1):
        if c % d == 0 and d <= max_cb:
            cb = d
    return cb


def dwt(x):
    """x: (N, C, H, W) -> (N, 4*C, H//2, W//2), matching dwt_init."""
    n, c, h, w = x.shape
    assert h % 2 == 0 and w % 2 == 0, "DWT needs even spatial dims"
    ho, wo = h // 2, w // 2

    cb = _pick_channel_block(c, h, w, jnp.dtype(x.dtype).itemsize)
    # TODO(synk): planes larger than ~8 MiB per channel would additionally need
    # spatial (H) tiling; not required for this module's usage.

    grid = (n, c // cb)

    in_spec = pl.BlockSpec((1, cb, h, w), lambda ni, ci: (ni, ci, 0, 0))
    out_spec = pl.BlockSpec((1, 4, cb, ho, wo), lambda ni, ci: (ni, 0, ci, 0, 0))

    out = pl.pallas_call(
        _dwt_kernel,
        out_shape=jax.ShapeDtypeStruct((n, 4, c, ho, wo), x.dtype),
        grid_spec=pltpu.PrefetchScalarGridSpec(
            num_scalar_prefetch=0,
            grid=grid,
            in_specs=[in_spec],
            out_specs=out_spec,
        ),
        compiler_params=pltpu.CompilerParams(
            dimension_semantics=("parallel", "parallel"),
            vmem_limit_bytes=48 * 1024 * 1024,
        ),
    )(x)

    # (N, 4, C, Ho, Wo) -> (N, 4*C, Ho, Wo) is a contiguous (free) reshape and
    # reproduces torch.cat((LL, HL, LH, HH), dim=1) channel ordering.
    return out.reshape(n, 4 * c, ho, wo)


dwt = jax.jit(dwt)


def _dwt_ref(x):
    x01 = x[:, :, 0::2, :] / 2
    x02 = x[:, :, 1::2, :] / 2
    x1 = x01[:, :, :, 0::2]
    x2 = x02[:, :, :, 0::2]
    x3 = x01[:, :, :, 1::2]
    x4 = x02[:, :, :, 1::2]
    x_LL = x1 + x2 + x3 + x4
    x_HL = -x1 - x2 + x3 + x4
    x_LH = -x1 + x2 - x3 + x4
    x_HH = x1 - x2 - x3 + x4
    return jnp.concatenate((x_LL, x_HL, x_LH, x_HH), axis=1)


if __name__ == "__main__":
    key = jax.random.PRNGKey(0)
    x = jax.random.normal(key, (2, 4, 16, 16), dtype=jnp.float32)

    out = jax.block_until_ready(dwt(x))
    ref = _dwt_ref(x)

    assert out.shape == (2, 16, 8, 8), out.shape
    assert jnp.allclose(out, ref, atol=1e-5, rtol=1e-5), float(jnp.max(jnp.abs(out - ref)))
    print("KERNEL_OK")
</pallas_src>

<mosaic_0001>
module attributes {stable_mosaic.version = 11 : i64} {
  func.func @_dwt_kernel(%arg0: i32, %arg1: i32, %arg2: memref<1x4x16x16xf32, #tpu.memory_space<vmem>>, %arg3: memref<1x4x4x8x8xf32, #tpu.memory_space<vmem>>) attributes {dimension_semantics = [#tpu.dimension_semantics<parallel>, #tpu.dimension_semantics<parallel>], iteration_bounds = array<i64: 2, 1>, scalar_prefetch = 0 : i64, scratch_operands = 0 : i64, tpu.core_type = #tpu.core_type<tc>, window_params = [{transform_indices = @transform_0, window_bounds = array<i64: 1, 4, 16, 16>}, {transform_indices = @transform_1, window_bounds = array<i64: 1, 4, 4, 8, 8>}]} {
    %c0 = arith.constant 0 : index
    %c0_0 = arith.constant 0 : index
    %c0_1 = arith.constant 0 : index
    %c0_2 = arith.constant 0 : index
    %0 = vector.load %arg2[%c0, %c0_0, %c0_1, %c0_2] : memref<1x4x16x16xf32, #tpu.memory_space<vmem>>, vector<1x4x16x16xf32>
    %1 = vector.shape_cast %0 : vector<1x4x16x16xf32> to vector<4x16x16xf32>
    %cst = arith.constant 5.000000e-01 : f32
    %2 = vector.broadcast %cst : f32 to vector<4x16x16xf32>
    %3 = arith.mulf %1, %2 : vector<4x16x16xf32>
    %4 = vector.shape_cast %3 : vector<4x16x16xf32> to vector<4x16x8x2xf32>
    %5 = vector.extract_strided_slice %4 {offsets = [0, 0, 0, 0], sizes = [4, 16, 8, 1], strides = [1, 1, 1, 1]} : vector<4x16x8x2xf32> to vector<4x16x8x1xf32>
    %6 = vector.shape_cast %5 : vector<4x16x8x1xf32> to vector<4x16x8xf32>
    %7 = vector.extract_strided_slice %4 {offsets = [0, 0, 0, 1], sizes = [4, 16, 8, 1], strides = [1, 1, 1, 1]} : vector<4x16x8x2xf32> to vector<4x16x8x1xf32>
    %8 = vector.shape_cast %7 : vector<4x16x8x1xf32> to vector<4x16x8xf32>
    %9 = arith.addf %6, %8 : vector<4x16x8xf32>
    %10 = arith.subf %8, %6 : vector<4x16x8xf32>
    %11 = vector.shape_cast %9 : vector<4x16x8xf32> to vector<4x8x2x8xf32>
    %12 = vector.shape_cast %10 : vector<4x16x8xf32> to vector<4x8x2x8xf32>
    %13 = vector.extract_strided_slice %11 {offsets = [0, 0, 0, 0], sizes = [4, 8, 1, 8], strides = [1, 1, 1, 1]} : vector<4x8x2x8xf32> to vector<4x8x1x8xf32>
    %14 = vector.shape_cast %13 : vector<4x8x1x8xf32> to vector<4x8x8xf32>
    %15 = vector.extract_strided_slice %11 {offsets = [0, 0, 1, 0], sizes = [4, 8, 1, 8], strides = [1, 1, 1, 1]} : vector<4x8x2x8xf32> to vector<4x8x1x8xf32>
    %16 = vector.shape_cast %15 : vector<4x8x1x8xf32> to vector<4x8x8xf32>
    %17 = arith.addf %14, %16 : vector<4x8x8xf32>
    %18 = vector.extract_strided_slice %11 {offsets = [0, 0, 1, 0], sizes = [4, 8, 1, 8], strides = [1, 1, 1, 1]} : vector<4x8x2x8xf32> to vector<4x8x1x8xf32>
    %19 = vector.shape_cast %18 : vector<4x8x1x8xf32> to vector<4x8x8xf32>
    %20 = vector.extract_strided_slice %11 {offsets = [0, 0, 0, 0], sizes = [4, 8, 1, 8], strides = [1, 1, 1, 1]} : vector<4x8x2x8xf32> to vector<4x8x1x8xf32>
    %21 = vector.shape_cast %20 : vector<4x8x1x8xf32> to vector<4x8x8xf32>
    %22 = arith.subf %19, %21 : vector<4x8x8xf32>
    %23 = vector.extract_strided_slice %12 {offsets = [0, 0, 0, 0], sizes = [4, 8, 1, 8], strides = [1, 1, 1, 1]} : vector<4x8x2x8xf32> to vector<4x8x1x8xf32>
    %24 = vector.shape_cast %23 : vector<4x8x1x8xf32> to vector<4x8x8xf32>
    %25 = vector.extract_strided_slice %12 {offsets = [0, 0, 1, 0], sizes = [4, 8, 1, 8], strides = [1, 1, 1, 1]} : vector<4x8x2x8xf32> to vector<4x8x1x8xf32>
    %26 = vector.shape_cast %25 : vector<4x8x1x8xf32> to vector<4x8x8xf32>
    %27 = arith.addf %24, %26 : vector<4x8x8xf32>
    %28 = vector.extract_strided_slice %12 {offsets = [0, 0, 1, 0], sizes = [4, 8, 1, 8], strides = [1, 1, 1, 1]} : vector<4x8x2x8xf32> to vector<4x8x1x8xf32>
    %29 = vector.shape_cast %28 : vector<4x8x1x8xf32> to vector<4x8x8xf32>
    %30 = vector.extract_strided_slice %12 {offsets = [0, 0, 0, 0], sizes = [4, 8, 1, 8], strides = [1, 1, 1, 1]} : vector<4x8x2x8xf32> to vector<4x8x1x8xf32>
    %31 = vector.shape_cast %30 : vector<4x8x1x8xf32> to vector<4x8x8xf32>
    %32 = arith.subf %29, %31 : vector<4x8x8xf32>
    %c0_3 = arith.constant 0 : index
    %c0_4 = arith.constant 0 : index
    %c0_5 = arith.constant 0 : index
    %c0_6 = arith.constant 0 : index
    %c0_7 = arith.constant 0 : index
    %33 = vector.load %arg3[%c0_3, %c0_4, %c0_5, %c0_6, %c0_7] : memref<1x4x4x8x8xf32, #tpu.memory_space<vmem>>, vector<1x1x4x8x8xf32>
    %34 = vector.shape_cast %33 : vector<1x1x4x8x8xf32> to vector<4x8x8xf32>
    %35 = vector.shape_cast %17 : vector<4x8x8xf32> to vector<1x1x4x8x8xf32>
    tpu.vector_store %arg3[%c0_3, %c0_4, %c0_5, %c0_6, %c0_7], %35 {strides = array<i32>} : memref<1x4x4x8x8xf32, #tpu.memory_space<vmem>>, vector<1x1x4x8x8xf32>,
    %c0_8 = arith.constant 0 : index
    %c1 = arith.constant 1 : index
    %c0_9 = arith.constant 0 : index
    %c0_10 = arith.constant 0 : index
    %c0_11 = arith.constant 0 : index
    %36 = vector.load %arg3[%c0_8, %c1, %c0_9, %c0_10, %c0_11] : memref<1x4x4x8x8xf32, #tpu.memory_space<vmem>>, vector<1x1x4x8x8xf32>
    %37 = vector.shape_cast %36 : vector<1x1x4x8x8xf32> to vector<4x8x8xf32>
    %38 = vector.shape_cast %27 : vector<4x8x8xf32> to vector<1x1x4x8x8xf32>
    tpu.vector_store %arg3[%c0_8, %c1, %c0_9, %c0_10, %c0_11], %38 {strides = array<i32>} : memref<1x4x4x8x8xf32, #tpu.memory_space<vmem>>, vector<1x1x4x8x8xf32>,
    %c0_12 = arith.constant 0 : index
    %c2 = arith.constant 2 : index
    %c0_13 = arith.constant 0 : index
    %c0_14 = arith.constant 0 : index
    %c0_15 = arith.constant 0 : index
    %39 = vector.load %arg3[%c0_12, %c2, %c0_13, %c0_14, %c0_15] : memref<1x4x4x8x8xf32, #tpu.memory_space<vmem>>, vector<1x1x4x8x8xf32>
    %40 = vector.shape_cast %39 : vector<1x1x4x8x8xf32> to vector<4x8x8xf32>
    %41 = vector.shape_cast %22 : vector<4x8x8xf32> to vector<1x1x4x8x8xf32>
    tpu.vector_store %arg3[%c0_12, %c2, %c0_13, %c0_14, %c0_15], %41 {strides = array<i32>} : memref<1x4x4x8x8xf32, #tpu.memory_space<vmem>>, vector<1x1x4x8x8xf32>,
    %c0_16 = arith.constant 0 : index
    %c3 = arith.constant 3 : index
    %c0_17 = arith.constant 0 : index
    %c0_18 = arith.constant 0 : index
    %c0_19 = arith.constant 0 : index
    %42 = vector.load %arg3[%c0_16, %c3, %c0_17, %c0_18, %c0_19] : memref<1x4x4x8x8xf32, #tpu.memory_space<vmem>>, vector<1x1x4x8x8xf32>
    %43 = vector.shape_cast %42 : vector<1x1x4x8x8xf32> to vector<4x8x8xf32>
    %44 = vector.shape_cast %32 : vector<4x8x8xf32> to vector<1x1x4x8x8xf32>
    tpu.vector_store %arg3[%c0_16, %c3, %c0_17, %c0_18, %c0_19], %44 {strides = array<i32>} : memref<1x4x4x8x8xf32, #tpu.memory_space<vmem>>, vector<1x1x4x8x8xf32>,
    return
  }
  func.func @transform_0(%arg0: i32, %arg1: i32) -> (i32, i32, i32, i32) {
    %c0_i32 = arith.constant 0 : i32
    %c0_i32_0 = arith.constant 0 : i32
    %c0_i32_1 = arith.constant 0 : i32
    return %arg0, %arg1, %c0_i32, %c0_i32_0 : i32, i32, i32, i32
  }
  func.func @transform_1(%arg0: i32, %arg1: i32) -> (i32, i32, i32, i32, i32) {
    %c0_i32 = arith.constant 0 : i32
    %c0_i32_0 = arith.constant 0 : i32
    %c0_i32_1 = arith.constant 0 : i32
    %c0_i32_2 = arith.constant 0 : i32
    return %arg0, %c0_i32, %arg1, %c0_i32_0, %c0_i32_1 : i32, i32, i32, i32, i32
  }
}

</mosaic_0001>

<bundles_post_ra>
// kernel: dwt.1
= control target key start
LH: loop header
LB: loop body
LE: loop exit
PB: predicated region body
PF: predicated region fallthrough
CT: control target
= control target key end

     0   :  { %6 = vsyncpa [#allocation3], 0  ;;  %s5769_s0 = inlined_call_operand.hbm [shape: f32[2,4,16,16], index: 0, kind: input, shape index: {}]   ;;  %s5770_s1 = inlined_call_operand.vmem [shape: f32[2,4,4,8,8], index: 1, kind: output, shape index: {}]  }
   0x1   :  { %8 = vsyncpa [#allocation3 + $0x1], 0  ;;  %s3635_s6 = smov 0   ;;  %s3637_s7 = smov 0  }
   0x2   :  { %s3639_s8 = smov 0   ;;  %s3641_s9 = smov 0  }
   0x3   :  { %s3643_s10 = smov 0   ;;  %s3645_s11 = smov 0  }
   0x4 LB: > { %s3426_s12 = sadd.s32 4294967295, %s3607_s11   ;;  %s26_s13 = sadd.s32 1, %s3603_s10  ;;  %s3607_s11 = sphi %s3645_s11, %s14_s11   ;;  %s3603_s10 = sphi %s3643_s10, %s6349_s10   ;;  %s3599_s9 = sphi %s3641_s9, %s6348_s9   ;;  %s3595_s8 = sphi %s3639_s8, %s6347_s8   ;;  %s3591_s7 = sphi %s3637_s7, %s6346_s7   ;;  %s3587_s6 = sphi %s3635_s6, %s6345_s6  }
   0x5   : > { %p28_p0 = scmp.ge.s32.totalorder %s26_s13, 2  ;;  %s35_s14 = sadd.s32 1, %s3595_s8 }
   0x6   : > { %p42_p1 = scmp.ne.s32.totalorder %s3595_s8, %s3591_s7  ;;  %p43_p2 = scmp.eq.s32.totalorder %s3607_s11, 0 }
   0x7   : > { %s6351_s13 = smov (%p28_p0, %s26_s13), 0  ;;  %p48_p4 = scmp.ne.s32.totalorder %s3591_s7, %s3587_s6 }
   0x8   : > { %p3671_p3 = por %p43_p2, %p42_p1  ;;  %s30_s16 = ssub.s32 %s3603_s10, %s6351_s13 }
   0x9   : > { %p49_p5 = scmp.eq.s32.totalorder %s3426_s12, 0  ;;  %p33_p6 = scmp.eq.s32.totalorder %s30_s16, 0 }
   0xa   : > { %p3459_p8 = scmp.lt.s32.totalorder %s3607_s11, 2  ;;  %s100_s19 = sand.u32 1, %s3595_s8  }
   0xb   : > { %p3678_p7 = por %p49_p5, %p48_p4  ;;  %s3451_s20 = sshll.u32 %s3603_s10, 10 }
   0xc   : > { %s3684_s18 = scalar_select %p33_p6, %s3595_s8, %s35_s14  }
   0xd   : > { %s3430_s21 = sshll.u32 %s100_s19, 6  ;;  %s113_s24 = scalar_lea.hbm %s5769_s0, %s3451_s20 }
   0xe   : > { %s104_s25 = scalar_lea.vmem [#allocation2], %s3430_s21  ;;  %p3693_p9 = pnand %p3459_p8, %p3671_p3 }
   0xf   : > { %s114_s26 = sshll.u32 %s104_s25, 4  ;;  %s101_s28 = scalar_lea.sflag [#allocation3], %s100_s19  ;;  %s115_s26 = int_to_ptr.vmem [resolvable:$true] %s114_s26 }
  0x10   : > { %p3531_p10 = pneg %p3693_p9  ;;  %s3542_s29 = scalar_lea.vmem %s115_s26, 1024 }
  0x11   : > { %p3543_p11 = scmp.ne.s32.totalorder %s115_s26, %s3542_s29  ;;  %s3609_s30 = smov [#allocation2]  }
  0x12   : > { %s3547_s2 = sshll.u32 %s3609_s30, 4  ;;  %s3548_s2 = int_to_ptr.vmem [resolvable:$false] %s3547_s2 }
  0x13   : > { %p3545_p12 = pnand %p3543_p11, %p3531_p10  ;;  %s3549_s3 = scalar_lea.vmem %s3548_s2, 2048 }
  0x14   : > { %p3550_p0 = scmp.lt.s32.totalorder %s115_s26, %s3548_s2  ;;  %p3551_p1 = scmp.lt.s32.totalorder %s3549_s3, %s3542_s29 }
  0x15   : > { %p3546_p13 = pneg %p3545_p12 }
  0x16   : > { %p3552_p2 = por %p3551_p1, %p3550_p0 }
  0x18   : > { %p3553_p3 = pnand %p3552_p2, %p3546_p13 }
  0x1a   : > { %3556 = shalt.err (!%p3553_p3)
}
  0x1b   : > { %s3610_s4 = smov 128   ;;  %s3611_s5 = smov 8  }
  0x1c   : > { %3458 = dma.hbm_to_vmem [thread:$0]  (!%p3693_p9), %s113_s24, 1024, %s115_s26, %s101_s28, %s3610_s4, %s3610_s4, %s3611_s5  }
  0x1d   : > { %p3433_p4 = scmp.ge.s32.totalorder %s3607_s11, 1  ;;  %p122_p5 = scmp.lt.s32.totalorder %s3607_s11, 3 }
  0x1f   : > { %p123_p6 = pnand %p3433_p4, %p122_p5 }
  0x21   : > { %126 = sbr.rel (%p123_p6) target bundleno = 913 (0x391), region = 24 }
  0x26   : > { %s128_s6 = sand.u32 1, %s3591_s7  }
  0x27   : > { %s3434_s12 = sshll.u32 %s128_s6, 6  ;;  %s129_s14 = scalar_lea.sflag [#allocation3], %s128_s6 }
  0x28   : > { %s132_s15 = scalar_lea.vmem [#allocation2], %s3434_s12 }
  0x29   : > { %3582 = dma.done.wait (%p3678_p7), %s129_s14, 1024  }
  0x2a   : > { %3584 = vsyncadd (%p3678_p7), %s129_s14, 4294966272  ;;  %v168_v0 = vld [vmem:[%s132_s15 + $0x10] sm:$0xff]  ;;  %v166_v1 = vld [vmem:[%s132_s15] sm:$0xff]  ;;  %s3612_s16 = smov 126   ;;  %s3613_s17 = smov 124   ;;  %v5774_v63 = vlaneseq  ;;  %vm2408_vm0 = vcmask 1041409  }
  0x2b   : > { %v169_v2 = vld [vmem:[%s132_s15 + $0x18] sm:$0xff]  ;;  %v3708_v3 = vmul.f32 0.5, %v168_v0  ;;  %v3710_v4 = vmul.f32 0.5, %v166_v1  ;;  %v167_v5 = vld [vmem:[%s132_s15 + $0x8] sm:$0xff]  ;;  %v170_v9 = vld [vmem:[%s132_s15 + $0x20] sm:$0xff]  ;;  %s3614_s19 = smov 122  }
  0x2c   : > { %v3714_v6 = vmul.f32 0.5, %v169_v2  ;;  %v3716_v7 = vmul.f32 0.5, %v167_v5  ;;  %v171_v8 = vld [vmem:[%s132_s15 + $0x28] sm:$0xff]  ;;  %v3722_v11 = vmul.f32 0.5, %v170_v9  ;;  %v173_v12 = vld [vmem:[%s132_s15 + $0x38] sm:$0xff]  ;;  %v172_v13 = vld [vmem:[%s132_s15 + $0x30] sm:$0xff] }
  0x2d   : > { %194 = vrot.lane.b32.xlu1 %v3708_v3, %s3612_s16  ;;  %190 = vrot.lane.b32.xlu0 %v3710_v4, %s3612_s16  ;;  %v3720_v10 = vmul.f32 0.5, %v171_v8  ;;  %v3726_v14 = vmul.f32 0.5, %v173_v12  ;;  %v3728_v15 = vmul.f32 0.5, %v172_v13  ;;  %s3615_s20 = smov 120   ;;  %s3616_s21 = smov 118   ;;  %v3865_v2 = vshrl.u32 %v5774_v63, 7 }
  0x2e   : > { %s3617_s22 = smov 116   ;;  %s3618_s23 = smov 114   ;;  %v3619_v61 = vmov 1983009808   ;;  %v3620_v13 = vmov 1934713408  }
  0x2f   : > { %5969 = vst [vmem:[#allocation5_spill] sm:$0xff] %v3726_v14  ;;  %5970 = vst [vmem:[#allocation6_spill] sm:$0xff] %v3728_v15  ;;  %v361_v62 = vunpack.c.l.s4 %v3619_v61  ;;  %s3621_s24 = smov 127   ;;  %s3622_s25 = smov 1   ;;  %vm2410_vm1 = vcmask 1042434   ;;  %vm2412_vm2 = vcmask 1043459  }
  0x30   : > { %5981 = vst [vmem:[#allocation17_spill] sm:$0xff] %v3865_v2  ;;  %p157_p7 = scmp.lt.s32.totalorder %s3599_s9, 1  ;;  %vm2414_vm3 = vcmask 1044484   ;;  %vm2416_vm4 = vcmask 1045509   ;;  %vm2418_vm5 = vcmask 1046534   ;;  %vm2420_vm6 = vcmask 1047559  }
  0x31   : > { %196 = vrot.lane.b32.xlu1 %v3714_v6, %s3612_s16  ;;  %192 = vrot.lane.b32.xlu0 %v3716_v7, %s3612_s16  ;;  %v362_v1 = vunpack.c.0.s8 %v361_v62  ;;  %vm2447_vm7 = vcmask 64512  }
  0x32   : > { %s6353_s9 = smov (!%p157_p7, %s3599_s9), 1 }
  0x33   : > { %s3452_s26 = sshll.u32 %s6353_s9, 7 }
  0x34   : > { %s5176_s28 = scalar_lea.vmem %s5770_s1, %s3452_s26 }
  0x35   : > { %200 = vrot.lane.b32.xlu1 %v3720_v10, %s3612_s16  ;;  %198 = vrot.lane.b32.xlu0 %v3722_v11, %s3612_s16 }
  0x39   : > { %204 = vrot.lane.b32.xlu1 %v3726_v14, %s3612_s16  ;;  %202 = vrot.lane.b32.xlu0 %v3728_v15, %s3612_s16 }
  0x3d   : > { %216 = vrot.lane.b32.xlu1 %v3716_v7, %s3613_s17  ;;  %214 = vrot.lane.b32.xlu0 %v3710_v4, %s3613_s17 }
  0x41   : > { %220 = vrot.lane.b32.xlu1 %v3714_v6, %s3613_s17  ;;  %218 = vrot.lane.b32.xlu0 %v3708_v3, %s3613_s17 }
  0x45   : > { %224 = vrot.lane.b32.xlu1 %v3720_v10, %s3613_s17  ;;  %222 = vrot.lane.b32.xlu0 %v3722_v11, %s3613_s17 }
  0x49   : > { %228 = vrot.lane.b32.xlu1 %v3726_v14, %s3613_s17  ;;  %226 = vrot.lane.b32.xlu0 %v3728_v15, %s3613_s17 }
  0x4d   : > { %240 = vrot.lane.b32.xlu1 %v3716_v7, %s3614_s19  ;;  %238 = vrot.lane.b32.xlu0 %v3710_v4, %s3614_s19 }
  0x51   : > { %244 = vrot.lane.b32.xlu1 %v3714_v6, %s3614_s19  ;;  %242 = vrot.lane.b32.xlu0 %v3708_v3, %s3614_s19 }
  0x55   : > { %248 = vrot.lane.b32.xlu1 %v3720_v10, %s3614_s19  ;;  %246 = vrot.lane.b32.xlu0 %v3722_v11, %s3614_s19 }
  0x59   : > { %252 = vrot.lane.b32.xlu1 %v3726_v14, %s3614_s19  ;;  %250 = vrot.lane.b32.xlu0 %v3728_v15, %s3614_s19 }
  0x5d   : > { %264 = vrot.lane.b32.xlu1 %v3716_v7, %s3615_s20  ;;  %262 = vrot.lane.b32.xlu0 %v3710_v4, %s3615_s20 }
  0x61   : > { %268 = vrot.lane.b32.xlu1 %v3714_v6, %s3615_s20  ;;  %266 = vrot.lane.b32.xlu0 %v3708_v3, %s3615_s20 }
  0x65   : > { %272 = vrot.lane.b32.xlu1 %v3720_v10, %s3615_s20  ;;  %270 = vrot.lane.b32.xlu0 %v3722_v11, %s3615_s20 }
  0x69   : > { %276 = vrot.lane.b32.xlu1 %v3726_v14, %s3615_s20  ;;  %274 = vrot.lane.b32.xlu0 %v3728_v15, %s3615_s20 }
  0x6d   : > { %288 = vrot.lane.b32.xlu1 %v3716_v7, %s3616_s21  ;;  %286 = vrot.lane.b32.xlu0 %v3710_v4, %s3616_s21 }
  0x71   : > { %292 = vrot.lane.b32.xlu1 %v3714_v6, %s3616_s21  ;;  %290 = vrot.lane.b32.xlu0 %v3708_v3, %s3616_s21 }
  0x75   : > { %296 = vrot.lane.b32.xlu1 %v3720_v10, %s3616_s21  ;;  %294 = vrot.lane.b32.xlu0 %v3722_v11, %s3616_s21 }
  0x79   : > { %300 = vrot.lane.b32.xlu1 %v3726_v14, %s3616_s21  ;;  %298 = vrot.lane.b32.xlu0 %v3728_v15, %s3616_s21 }
  0x7d   : > { %312 = vrot.lane.b32.xlu1 %v3716_v7, %s3617_s22  ;;  %310 = vrot.lane.b32.xlu0 %v3710_v4, %s3617_s22 }
  0x81   : > { %316 = vrot.lane.b32.xlu1 %v3714_v6, %s3617_s22  ;;  %314 = vrot.lane.b32.xlu0 %v3708_v3, %s3617_s22 }
  0x85   : > { %320 = vrot.lane.b32.xlu1 %v3720_v10, %s3617_s22  ;;  %318 = vrot.lane.b32.xlu0 %v3722_v11, %s3617_s22 }
  0x89   : > { %324 = vrot.lane.b32.xlu1 %v3726_v14, %s3617_s22  ;;  %322 = vrot.lane.b32.xlu0 %v3728_v15, %s3617_s22 }
  0x8d   : > { %336 = vrot.lane.b32.xlu1 %v3716_v7, %s3618_s23  ;;  %334 = vrot.lane.b32.xlu0 %v3710_v4, %s3618_s23 }
  0x91   : > { %340 = vrot.lane.b32.xlu1 %v3714_v6, %s3618_s23  ;;  %338 = vrot.lane.b32.xlu0 %v3708_v3, %s3618_s23 }
  0x95   : > { %344 = vrot.lane.b32.xlu1 %v3720_v10, %s3618_s23  ;;  %342 = vrot.lane.b32.xlu0 %v3722_v11, %s3618_s23 }
  0x99   : > { %348 = vrot.lane.b32.xlu1 %v3726_v14, %s3618_s23  ;;  %346 = vrot.lane.b32.xlu0 %v3728_v15, %s3618_s23 }
  0x9f   : > { %v3780_v16 = vpop.permute.xlu1 %194  ;;  %v3782_v17 = vpop.permute.xlu0 %190 }
  0xa3   : > { %v3784_v18 = vpop.permute.xlu1 %196  ;;  %v3786_v19 = vpop.permute.xlu0 %192 }
  0xa7   : > { %v3788_v20 = vpop.permute.xlu1 %200  ;;  %v3790_v21 = vpop.permute.xlu0 %198 }
  0xab   : > { %v3792_v22 = vpop.permute.xlu1 %204  ;;  %v3794_v23 = vpop.permute.xlu0 %202 }
  0xac   : > { %5971 = vst [vmem:[#allocation7_spill] sm:$0xff] %v3792_v22  ;;  %5972 = vst [vmem:[#allocation8_spill] sm:$0xff] %v3794_v23  ;;  %v3871_v22 = vsub.s32 %v362_v1, %v3865_v2 }
  0xaf   : > { %v3796_v24 = vpop.permute.xlu1 %216  ;;  %v3798_v25 = vpop.permute.xlu0 %214 }
  0xb0   : > { %v358_v61 = vcombine.low %v3710_v4, %v3798_v25 }
  0xb2   : > { %v366_v15 = vrot.slane %v358_v61, %v3871_v22 }
  0xb3   : > { %v3800_v26 = vpop.permute.xlu1 %220  ;;  %v3802_v27 = vpop.permute.xlu0 %218 }
  0xb7   : > { %v3804_v28 = vpop.permute.xlu1 %224  ;;  %v3806_v29 = vpop.permute.xlu0 %222 }
  0xbb   : > { %v3808_v30 = vpop.permute.xlu1 %228  ;;  %v3810_v31 = vpop.permute.xlu0 %226 }
  0xbc   : > { %5973 = vst [vmem:[#allocation9_spill] sm:$0xff] %v3808_v30  ;;  %5974 = vst [vmem:[#allocation10_spill] sm:$0xff] %v3810_v31 }
  0xbf   : > { %v3812_v32 = vpop.permute.xlu1 %240  ;;  %v239_v33 = vpop.permute.xlu0 %238 }
  0xc0   : > { %v374_v8 = vcombine.low %v3782_v17, %v239_v33  ;;  %v375_v1 = vcombine.high %v3782_v17, %v239_v33 }
  0xc2   : > { %v382_v63 = vrot.slane %v374_v8, %v3871_v22  ;;  %v389_v61 = vrot.slane %v375_v1, %v3871_v22 }
  0xc3   : > { %v3814_v34 = vpop.permute.xlu1 %244  ;;  %v3816_v35 = vpop.permute.xlu0 %242 }
  0xc7   : > { %v3818_v36 = vpop.permute.xlu1 %248  ;;  %v3820_v37 = vpop.permute.xlu0 %246 }
  0xcb   : > { %v3822_v38 = vpop.permute.xlu1 %252  ;;  %v3824_v39 = vpop.permute.xlu0 %250 }
  0xcc   : > { %5975 = vst [vmem:[#allocation11_spill] sm:$0xff] %v3822_v38  ;;  %5976 = vst [vmem:[#allocation12_spill] sm:$0xff] %v3824_v39 }
  0xcf   : > { %v3826_v40 = vpop.permute.xlu1 %264  ;;  %v263_v41 = vpop.permute.xlu0 %262 }
  0xd3   : > { %v3828_v42 = vpop.permute.xlu1 %268  ;;  %v3830_v43 = vpop.permute.xlu0 %266 }
  0xd7   : > { %v3832_v44 = vpop.permute.xlu1 %272  ;;  %v3834_v45 = vpop.permute.xlu0 %270 }
  0xdb   : > { %v3836_v46 = vpop.permute.xlu1 %276  ;;  %v3838_v47 = vpop.permute.xlu0 %274 }
  0xdc   : > { %5977 = vst [vmem:[#allocation13_spill] sm:$0xff] %v3836_v46  ;;  %5978 = vst [vmem:[#allocation14_spill] sm:$0xff] %v3838_v47  ;;  %v425_v46 = vunpack.c.l.s4 %v3620_v13  ;;  %v422_v47 = vcombine.low %v366_v15, %v382_v63 }
  0xdf   : > { %v3840_v48 = vpop.permute.xlu1 %288  ;;  %v287_v49 = vpop.permute.xlu0 %286 }
  0xe3   : > { %v3842_v50 = vpop.permute.xlu1 %292  ;;  %v3844_v51 = vpop.permute.xlu0 %290 }
  0xe7   : > { %v3846_v52 = vpop.permute.xlu1 %296  ;;  %v3848_v53 = vpop.permute.xlu0 %294 }
  0xeb   : > { %v3850_v54 = vpop.permute.xlu1 %300  ;;  %v3852_v55 = vpop.permute.xlu0 %298 }
  0xec   : > { %5979 = vst [vmem:[#allocation15_spill] sm:$0xff] %v3850_v54  ;;  %v426_v54 = vunpack.c.0.s8 %v425_v46 }
  0xee   : > { %v3883_v23 = vsub.s32 %v426_v54, %v3865_v2 }
  0xef   : > { %v311_v56 = vpop.permute.xlu0 %310  ;;  %v3854_v57 = vpop.permute.xlu1 %312 }
  0xf0   : > { %v390_v9 = vcombine.low %v263_v41, %v311_v56  ;;  %v430_v17 = vrot.slane %v422_v47, %v3883_v23  ;;  %v526_v47 = vcombine.low %v3826_v40, %v3854_v57 }
  0xf2   : > { %v398_v14 = vrot.slane %v390_v9, %v3871_v22  ;;  %v534_v2 = vrot.slane %v526_v47, %v3871_v22 }
  0xf3   : > { %v3856_v58 = vpop.permute.xlu0 %314  ;;  %v3858_v59 = vpop.permute.xlu1 %316 }
  0xf7   : > { %v3860_v60 = vpop.permute.xlu0 %318  ;;  %v3867_v5 = vpop.permute.xlu1 %320 }
  0xfb   : > { %v3862_v0 = vpop.permute.xlu0 %322  ;;  %v3878_v30 = vpop.permute.xlu1 %324 }
  0xfc   : > { %5980 = vst [vmem:[#allocation16_spill] sm:$0xff] %v3862_v0  ;;  %v391_v0 = vcombine.high %v263_v41, %v311_v56 }
  0xff   : > { %v335_v12 = vpop.permute.xlu0 %334  ;;  %v337_v8 = vpop.permute.xlu1 %336 }
 0x100   : > { %v406_v38 = vcombine.low %v287_v49, %v335_v12  ;;  %v407_v31 = vcombine.high %v287_v49, %v335_v12  ;;  %v423_v49 = vcombine.high %v366_v15, %v382_v63  ;;  %v405_v12 = vrot.slane %v391_v0, %v3871_v22 }
 0x101   : > { %v542_v41 = vcombine.low %v3840_v48, %v337_v8  ;;  %v510_v15 = vcombine.low %v3786_v19, %v3812_v32 }
 0x102   : > { %v414_v62 = vrot.slane %v406_v38, %v3871_v22  ;;  %v359_v38 = vcombine.high %v3710_v4, %v3798_v25  ;;  %v421_v9 = vrot.slane %v407_v31, %v3871_v22  ;;  %v494_v25 = vcombine.low %v3716_v7, %v3796_v24 }
 0x103   : > { %v437_v63 = vrot.slane %v423_v49, %v3883_v23 }
 0x104   : > { %v454_v13 = vcombine.low %v398_v14, %v414_v62  ;;  %v455_v39 = vcombine.high %v398_v14, %v414_v62  ;;  %v373_v33 = vrot.slane %v359_v38, %v3871_v22  ;;  %v470_v54 = vcombine.low %v405_v12, %v421_v9 }
 0x105   : > { %v471_v0 = vcombine.high %v405_v12, %v421_v9  ;;  %v502_v1 = vrot.slane %v494_v25, %v3871_v22  ;;  %v543_v9 = vcombine.high %v3840_v48, %v337_v8 }
 0x106   : > { %v462_v46 = vrot.slane %v454_v13, %v3883_v23  ;;  %v469_v14 = vrot.slane %v455_v39, %v3883_v23  ;;  %v438_v31 = vcombine.low %v373_v33, %v389_v61  ;;  %v550_v39 = vrot.slane %v542_v41, %v3871_v22 }
 0x107   : > { %v478_v13 = vrot.slane %v470_v54, %v3883_v23  ;;  %v485_v54 = vrot.slane %v471_v0, %v3883_v23  ;;  %v557_v8 = vrot.slane %v543_v9, %v3871_v22  ;;  %v662_v9 = vcombine.low %v3830_v43, %v3856_v58 }
 0x108   : > { %v3894_v56 = vcombine.high %v430_v17, %v462_v46  ;;  %v3896_v4 = vcombine.low %v430_v17, %v462_v46  ;;  %v3911_v62 = vcombine.high %v437_v63, %v469_v14  ;;  %v3915_v38 = vcombine.low %v437_v63, %v469_v14 }
 0x109   : > { %v518_v46 = vrot.slane %v510_v15, %v3871_v22  ;;  %v439_v17 = vcombine.high %v373_v33, %v389_v61  ;;  %v446_v49 = vrot.slane %v438_v31, %v3883_v23  ;;  %v590_v12 = vcombine.low %v534_v2, %v550_v39 }
 0x10a   : > { %1512 = vrot.lane.b32.xlu1 %v3894_v56, %s3621_s24  ;;  %1510 = vrot.lane.b32.xlu0 %v3896_v4, %s3621_s24  ;;  %5982 = vst [vmem:[#allocation18_spill] sm:$0xff] %v3911_v62  ;;  %5983 = vst [vmem:[#allocation19_spill] sm:$0xff] %v3915_v38  ;;  %v495_v61 = vcombine.high %v3716_v7, %v3796_v24  ;;  %v511_v14 = vcombine.high %v3786_v19, %v3812_v32  ;;  %v339_v32 = vpop.permute.xlu0 %338 }
 0x10b   : > { %v3925_v41 = vcombine.high %v446_v49, %v478_v13  ;;  %v3930_v33 = vcombine.low %v446_v49, %v478_v13  ;;  %v558_v25 = vcombine.low %v502_v1, %v518_v46  ;;  %v527_v15 = vcombine.high %v3826_v40, %v3854_v57 }
 0x10c   : > { %v453_v48 = vrot.slane %v439_v17, %v3883_v23  ;;  %v591_v7 = vcombine.high %v534_v2, %v550_v39  ;;  %v598_v31 = vrot.slane %v590_v12, %v3883_v23  ;;  %v509_v19 = vrot.slane %v495_v61, %v3871_v22 }
 0x10d   : > { %v525_v40 = vrot.slane %v511_v14, %v3871_v22  ;;  %v559_v57 = vcombine.high %v502_v1, %v518_v46  ;;  %v541_v63 = vrot.slane %v527_v15, %v3871_v22  ;;  %v566_v0 = vrot.slane %v558_v25, %v3883_v23 }
 0x10e   : > { %1516 = vrot.lane.b32.xlu1 %v3911_v62, %s3621_s24  ;;  %1514 = vrot.lane.b32.xlu0 %v3915_v38, %s3621_s24  ;;  %v3942_v24 = vcombine.high %v453_v48, %v485_v54  ;;  %v3946_v47 = vcombine.low %v453_v48, %v485_v54  ;;  %v678_v39 = vcombine.low %v3844_v51, %v339_v32 }
 0x10f   : > { %v606_v2 = vcombine.low %v541_v63, %v557_v8  ;;  %v3956_v13 = vcombine.high %v566_v0, %v598_v31  ;;  %v605_v17 = vrot.slane %v591_v7, %v3883_v23  ;;  %v3959_v49 = vcombine.low %v566_v0, %v598_v31 }
 0x110   : > { %v574_v1 = vcombine.low %v509_v19, %v525_v40  ;;  %v646_v46 = vcombine.low %v3780_v16, %v3816_v35  ;;  %v573_v12 = vrot.slane %v559_v57, %v3883_v23  ;;  %v630_v54 = vcombine.low %v3708_v3, %v3802_v27 }
 0x111   : > { %5984 = vst [vmem:[#allocation20_spill] sm:$0xff] %v3956_v13  ;;  %5985 = vst [vmem:[#allocation21_spill] sm:$0xff] %v3959_v49  ;;  %v607_v61 = vcombine.high %v541_v63, %v557_v8  ;;  %v686_v14 = vrot.slane %v678_v39, %v3871_v22  ;;  %v614_v15 = vrot.slane %v606_v2, %v3883_v23 }
 0x112   : > { %1520 = vrot.lane.b32.xlu1 %v3925_v41, %s3621_s24  ;;  %1518 = vrot.lane.b32.xlu0 %v3930_v33, %s3621_s24  ;;  %v3973_v25 = vcombine.high %v573_v12, %v605_v17  ;;  %v3976_v48 = vcombine.low %v573_v12, %v605_v17  ;;  %v575_v7 = vcombine.high %v509_v19, %v525_v40 }
 0x113   : > { %v654_v31 = vrot.slane %v646_v46, %v3871_v22  ;;  %v670_v57 = vrot.slane %v662_v9, %v3871_v22  ;;  %v582_v0 = vrot.slane %v574_v1, %v3883_v23  ;;  %v638_v8 = vrot.slane %v630_v54, %v3871_v22 }
 0x114   : > { %v679_v63 = vcombine.high %v3844_v51, %v339_v32  ;;  %v621_v19 = vrot.slane %v607_v61, %v3883_v23  ;;  %v647_v17 = vcombine.high %v3780_v16, %v3816_v35  ;;  %v663_v1 = vcombine.high %v3830_v43, %v3856_v58  ;;  %v341_v35 = vpop.permute.xlu1 %340 }
 0x115   : > { %v726_v2 = vcombine.low %v670_v57, %v686_v14  ;;  %v3987_v39 = vcombine.high %v582_v0, %v614_v15  ;;  %v3990_v40 = vcombine.low %v582_v0, %v614_v15  ;;  %v694_v46 = vcombine.low %v638_v8, %v654_v31 }
 0x116   : > { %1524 = vrot.lane.b32.xlu1 %v3942_v24, %s3621_s24  ;;  %1522 = vrot.lane.b32.xlu0 %v3946_v47, %s3621_s24  ;;  %v589_v9 = vrot.slane %v575_v7, %v3883_v23  ;;  %v631_v51 = vcombine.high %v3708_v3, %v3802_v27  ;;  %v693_v32 = vrot.slane %v679_v63, %v3871_v22 }
 0x117   : > { %5986 = vst [vmem:[#allocation22_spill] sm:$0xff] %v3987_v39  ;;  %5987 = vst [vmem:[#allocation23_spill] sm:$0xff] %v3990_v40  ;;  %v727_v12 = vcombine.high %v670_v57, %v686_v14  ;;  %v734_v16 = vrot.slane %v726_v2, %v3883_v23  ;;  %v661_v58 = vrot.slane %v647_v17, %v3871_v22 }
 0x118   : > { %v4004_v54 = vcombine.high %v589_v9, %v621_v19  ;;  %v4007_v43 = vcombine.low %v589_v9, %v621_v19  ;;  %v695_v61 = vcombine.high %v638_v8, %v654_v31  ;;  %v677_v15 = vrot.slane %v663_v1, %v3871_v22 }
 0x119   : > { %v702_v3 = vrot.slane %v694_v46, %v3883_v23  ;;  %v645_v27 = vrot.slane %v631_v51, %v3871_v22  ;;  %v814_v14 = vcombine.low %v3842_v50, %v341_v35  ;;  %v741_v0 = vrot.slane %v727_v12, %v3883_v23 }
 0x11a   : > { %1528 = vrot.lane.b32.xlu1 %v3956_v13, %s3621_s24  ;;  %1526 = vrot.lane.b32.xlu0 %v3959_v49, %s3621_s24  ;;  %5988 = vst [vmem:[#allocation24_spill] sm:$0xff] %v4007_v43  ;;  %v742_v7 = vcombine.low %v677_v15, %v693_v32  ;;  %v766_v31 = vcombine.low %v3714_v6, %v3800_v26 }
 0x11b   : > { %v4018_v57 = vcombine.high %v702_v3, %v734_v16  ;;  %v4023_v8 = vcombine.low %v702_v3, %v734_v16  ;;  %v782_v63 = vcombine.low %v3784_v18, %v3814_v34  ;;  %v710_v2 = vcombine.low %v645_v27, %v661_v58 }
 0x11c   : > { %v798_v19 = vcombine.low %v3828_v42, %v3858_v59  ;;  %v709_v17 = vrot.slane %v695_v61, %v3883_v23  ;;  %v822_v46 = vrot.slane %v814_v14, %v3871_v22  ;;  %v743_v1 = vcombine.high %v677_v15, %v693_v32 }
 0x11d   : > { %5989 = vst [vmem:[#allocation25_spill] sm:$0xff] %v4018_v57  ;;  %5990 = vst [vmem:[#allocation26_spill] sm:$0xff] %v4023_v8  ;;  %v750_v51 = vrot.slane %v742_v7, %v3883_v23  ;;  %v774_v12 = vrot.slane %v766_v31, %v3871_v22  ;;  %v790_v3 = vrot.slane %v782_v63, %v3871_v22 }
 0x11e   : > { %1532 = vrot.lane.b32.xlu1 %v3973_v25, %s3621_s24  ;;  %1530 = vrot.lane.b32.xlu0 %v3976_v48, %s3621_s24  ;;  %v4035_v9 = vcombine.high %v709_v17, %v741_v0  ;;  %v4039_v16 = vcombine.low %v709_v17, %v741_v0  ;;  %v718_v61 = vrot.slane %v710_v2, %v3883_v23 }
 0x11f   : > { %v815_v32 = vcombine.high %v3842_v50, %v341_v35  ;;  %v757_v7 = vrot.slane %v743_v1, %v3883_v23  ;;  %v783_v0 = vcombine.high %v3784_v18, %v3814_v34  ;;  %v830_v31 = vcombine.low %v774_v12, %v790_v3  ;;  %v343_v34 = vpop.permute.xlu0 %342 }
 0x120   : > { %5991 = vst [vmem:[#allocation27_spill] sm:$0xff] %v4035_v9  ;;  %5992 = vst [vmem:[#allocation28_spill] sm:$0xff] %v4039_v16  ;;  %v4049_v14 = vcombine.high %v718_v61, %v750_v51  ;;  %v799_v63 = vcombine.high %v3828_v42, %v3858_v59  ;;  %v831_v59 = vcombine.high %v774_v12, %v790_v3 }
 0x121   : > { %v829_v35 = vrot.slane %v815_v32, %v3871_v22  ;;  %v797_v42 = vrot.slane %v783_v0, %v3871_v22  ;;  %v838_v17 = vrot.slane %v830_v31, %v3883_v23  ;;  %v918_v3 = vcombine.low %v3790_v21, %v3820_v37 }
 0x122   : > { %1536 = vrot.lane.b32.xlu1 %v3987_v39, %s3621_s24  ;;  %1534 = vrot.lane.b32.xlu0 %v3990_v40, %s3621_s24  ;;  %5993 = vst [vmem:[#allocation29_spill] sm:$0xff] %v4049_v14  ;;  %v934_v32 = vcombine.low %v3834_v45, %v3860_v60 }
 0x126   : > { %1540 = vrot.lane.b32.xlu1 %v4004_v54, %s3621_s24  ;;  %1538 = vrot.lane.b32.xlu0 %v4007_v43, %s3621_s24  ;;  %v711_v43 = vcombine.high %v645_v27, %v661_v58  ;;  %v767_v58 = vcombine.high %v3714_v6, %v3800_v26  ;;  %v4054_v27 = vcombine.low %v718_v61, %v750_v51 }
 0x128   : > { %5994 = vst [vmem:[#allocation30_spill] sm:$0xff] %v4054_v27  ;;  %v725_v50 = vrot.slane %v711_v43, %v3883_v23  ;;  %v781_v18 = vrot.slane %v767_v58, %v3871_v22  ;;  %v813_v43 = vrot.slane %v799_v63, %v3871_v22 }
 0x12a   : > { %1544 = vrot.lane.b32.xlu1 %v4018_v57, %s3621_s24  ;;  %1542 = vrot.lane.b32.xlu0 %v4023_v8, %s3621_s24  ;;  %v806_v57 = vrot.slane %v798_v19, %v3871_v22  ;;  %v4066_v26 = vcombine.high %v725_v50, %v757_v7  ;;  %v4070_v19 = vcombine.low %v725_v50, %v757_v7 }
 0x12b   : > { %v846_v12 = vcombine.low %v781_v18, %v797_v42  ;;  %v902_v7 = vcombine.low %v3722_v11, %v3806_v29  ;;  %v879_v58 = vcombine.high %v813_v43, %v829_v35 }
 0x12c   : > { %v862_v15 = vcombine.low %v806_v57, %v822_v46  ;;  %v863_v6 = vcombine.high %v806_v57, %v822_v46  ;;  %5995 = vst [vmem:[#allocation31_spill] sm:$0xff] %v4066_v26  ;;  %5996 = vst [vmem:[#allocation32_spill] sm:$0xff] %v4070_v19  ;;  %v878_v57 = vcombine.low %v813_v43, %v829_v35 }
 0x12d   : > { %v950_v46 = vcombine.low %v3848_v53, %v343_v34  ;;  %v910_v35 = vrot.slane %v902_v7, %v3871_v22  ;;  %v951_v43 = vcombine.high %v3848_v53, %v343_v34  ;;  %v903_v53 = vcombine.high %v3722_v11, %v3806_v29 }
 0x12e   : > { %1548 = vrot.lane.b32.xlu1 %v4035_v9, %s3621_s24  ;;  %1546 = vrot.lane.b32.xlu0 %v4039_v16, %s3621_s24  ;;  %v870_v2 = vrot.slane %v862_v15, %v3883_v23  ;;  %v877_v51 = vrot.slane %v863_v6, %v3883_v23  ;;  %v845_v15 = vrot.slane %v831_v59, %v3883_v23 }
 0x12f   : > { %v958_v0 = vrot.slane %v950_v46, %v3871_v22  ;;  %v886_v63 = vrot.slane %v878_v57, %v3883_v23  ;;  %v847_v6 = vcombine.high %v781_v18, %v797_v42  ;;  %v942_v59 = vrot.slane %v934_v32, %v3871_v22 }
 0x130   : > { %v4080_v1 = vcombine.high %v838_v17, %v870_v2  ;;  %v4083_v61 = vcombine.low %v838_v17, %v870_v2  ;;  %v4097_v31 = vcombine.high %v845_v15, %v877_v51  ;;  %v4100_v50 = vcombine.low %v845_v15, %v877_v51 }
 0x131   : > { %v926_v2 = vrot.slane %v918_v3, %v3871_v22  ;;  %v854_v17 = vrot.slane %v846_v12, %v3883_v23  ;;  %v998_v57 = vcombine.low %v942_v59, %v958_v0  ;;  %v893_v18 = vrot.slane %v879_v58, %v3883_v23 }
 0x132   : > { %1552 = vrot.lane.b32.xlu1 %v4049_v14, %s3621_s24  ;;  %1550 = vrot.lane.b32.xlu0 %v4054_v27, %s3621_s24  ;;  %5997 = vst [vmem:[#allocation33_spill] sm:$0xff] %v4080_v1  ;;  %5998 = vst [vmem:[#allocation34_spill] sm:$0xff] %v4083_v61  ;;  %v919_v51 = vcombine.high %v3790_v21, %v3820_v37  ;;  %v935_v12 = vcombine.high %v3834_v45, %v3860_v60  ;;  %v345_v37 = vpop.permute.xlu1 %344 }
 0x133   : > { %5999 = vst [vmem:[#allocation35_spill] sm:$0xff] %v4097_v31  ;;  %6000 = vst [vmem:[#allocation36_spill] sm:$0xff] %v4100_v50  ;;  %v4111_v46 = vcombine.high %v854_v17, %v886_v63  ;;  %v4114_v42 = vcombine.low %v854_v17, %v886_v63  ;;  %v966_v3 = vcombine.low %v910_v35, %v926_v2 }
 0x134   : > { %v861_v32 = vrot.slane %v847_v6, %v3883_v23  ;;  %v965_v34 = vrot.slane %v951_v43, %v3871_v22  ;;  %v999_v15 = vcombine.high %v942_v59, %v958_v0  ;;  %v1006_v21 = vrot.slane %v998_v57, %v3883_v23 }
 0x135   : > { %6001 = vst [vmem:[#allocation37_spill] sm:$0xff] %v4111_v46  ;;  %6002 = vst [vmem:[#allocation38_spill] sm:$0xff] %v4114_v42  ;;  %v933_v60 = vrot.slane %v919_v51, %v3871_v22  ;;  %v967_v58 = vcombine.high %v910_v35, %v926_v2  ;;  %v949_v63 = vrot.slane %v935_v12, %v3871_v22 }
 0x136   : > { %1556 = vrot.lane.b32.xlu1 %v4066_v26, %s3621_s24  ;;  %1554 = vrot.lane.b32.xlu0 %v4070_v19, %s3621_s24  ;;  %v4128_v7 = vcombine.high %v861_v32, %v893_v18  ;;  %v4131_v45 = vcombine.low %v861_v32, %v893_v18  ;;  %v974_v11 = vrot.slane %v966_v3, %v3883_v23 }
 0x137   : > { %v917_v29 = vrot.slane %v903_v53, %v3871_v22  ;;  %v1086_v0 = vcombine.low %v3846_v52, %v345_v37  ;;  %v1014_v6 = vcombine.low %v949_v63, %v965_v34  ;;  %v1013_v17 = vrot.slane %v999_v15, %v3883_v23 }
 0x138   : > { %6003 = vst [vmem:[#allocation39_spill] sm:$0xff] %v4128_v7  ;;  %6004 = vst [vmem:[#allocation40_spill] sm:$0xff] %v4131_v45  ;;  %v4142_v59 = vcombine.high %v974_v11, %v1006_v21  ;;  %v1038_v2 = vcombine.low %v3720_v10, %v3804_v28  ;;  %v4147_v35 = vcombine.low %v974_v11, %v1006_v21 }
 0x139   : > { %v1054_v43 = vcombine.low %v3788_v20, %v3818_v36  ;;  %v982_v57 = vcombine.low %v917_v29, %v933_v60  ;;  %v1070_v18 = vcombine.low %v3832_v44, %v3867_v5  ;;  %v981_v51 = vrot.slane %v967_v58, %v3883_v23 }
 0x13a   : > { %1560 = vrot.lane.b32.xlu1 %v4080_v1, %s3621_s24  ;;  %1558 = vrot.lane.b32.xlu0 %v4083_v61, %s3621_s24  ;;  %6005 = vst [vmem:[#allocation41_spill] sm:$0xff] %v4142_v59  ;;  %6006 = vst [vmem:[#allocation42_spill] sm:$0xff] %v4147_v35  ;;  %v1094_v3 = vrot.slane %v1086_v0, %v3871_v22  ;;  %v1015_v12 = vcombine.high %v949_v63, %v965_v34 }
 0x13b   : > { %v4159_v32 = vcombine.high %v981_v51, %v1013_v17  ;;  %v1022_v53 = vrot.slane %v1014_v6, %v3883_v23  ;;  %v1046_v15 = vrot.slane %v1038_v2, %v3871_v22  ;;  %v4163_v21 = vcombine.low %v981_v51, %v1013_v17 }
 0x13c   : > { %v1062_v11 = vrot.slane %v1054_v43, %v3871_v22  ;;  %v990_v58 = vrot.slane %v982_v57, %v3883_v23  ;;  %v1087_v34 = vcombine.high %v3846_v52, %v345_v37  ;;  %v1029_v6 = vrot.slane %v1015_v12, %v3883_v23 }
 0x13d   : > { %6007 = vst [vmem:[#allocation43_spill] sm:$0xff] %v4159_v32  ;;  %6008 = vst [vmem:[#allocation44_spill] sm:$0xff] %v4163_v21  ;;  %v1055_v17 = vcombine.high %v3788_v20, %v3818_v36  ;;  %v1071_v43 = vcombine.high %v3832_v44, %v3867_v5  ;;  %v347_v36 = vpop.permute.xlu0 %346 }
 0x13e   : > { %1564 = vrot.lane.b32.xlu1 %v4097_v31, %s3621_s24  ;;  %1562 = vrot.lane.b32.xlu0 %v4100_v50, %s3621_s24  ;;  %v4173_v0 = vcombine.high %v990_v58, %v1022_v53  ;;  %v1102_v2 = vcombine.low %v1046_v15, %v1062_v11  ;;  %v1101_v37 = vrot.slane %v1087_v34, %v3871_v22  ;;  %v6016_v34 = vld [vmem:[#allocation8_spill] sm:$0xff] }
 0x13f   : > { %v1069_v44 = vrot.slane %v1055_v17, %v3871_v22  ;;  %v1103_v5 = vcombine.high %v1046_v15, %v1062_v11  ;;  %v6015_v11 = vld [vmem:[#allocation12_spill] sm:$0xff] }
 0x140   : > { %6009 = vst [vmem:[#allocation45_spill] sm:$0xff] %v4173_v0  ;;  %v1110_v51 = vrot.slane %v1102_v2, %v3883_v23 }
 0x141   : > { %v1117_v2 = vrot.slane %v1103_v5, %v3883_v23 }
 0x142   : > { %1568 = vrot.lane.b32.xlu1 %v4111_v46, %s3621_s24  ;;  %1566 = vrot.lane.b32.xlu0 %v4114_v42, %s3621_s24 }
 0x146   : > { %1572 = vrot.lane.b32.xlu1 %v4128_v7, %s3621_s24  ;;  %1570 = vrot.lane.b32.xlu0 %v4131_v45, %s3621_s24  ;;  %v983_v45 = vcombine.high %v917_v29, %v933_v60  ;;  %v1039_v60 = vcombine.high %v3720_v10, %v3804_v28  ;;  %v4178_v29 = vcombine.low %v990_v58, %v1022_v53 }
 0x148   : > { %6010 = vst [vmem:[#allocation46_spill] sm:$0xff] %v4178_v29  ;;  %v997_v52 = vrot.slane %v983_v45, %v3883_v23  ;;  %v1053_v20 = vrot.slane %v1039_v60, %v3871_v22  ;;  %v1085_v45 = vrot.slane %v1071_v43, %v3871_v22  ;;  %v6018_v60 = vld [vmem:[#allocation14_spill] sm:$0xff] }
 0x149   : > { %v6019_v43 = vld [vmem:[#allocation10_spill] sm:$0xff] }
 0x14a   : > { %1576 = vrot.lane.b32.xlu1 %v4142_v59, %s3621_s24  ;;  %1574 = vrot.lane.b32.xlu0 %v4147_v35, %s3621_s24  ;;  %v1078_v59 = vrot.slane %v1070_v18, %v3871_v22  ;;  %v4190_v28 = vcombine.high %v997_v52, %v1029_v6  ;;  %v4194_v18 = vcombine.low %v997_v52, %v1029_v6  ;;  %v6017_v6 = vld [vmem:[#allocation16_spill] sm:$0xff]  ;;  %v6020_v52 = vld [vmem:[#allocation6_spill] sm:$0xff] }
 0x14b   : > { %v1118_v15 = vcombine.low %v1053_v20, %v1069_v44  ;;  %v1206_v17 = vcombine.low %v6018_v60, %v6017_v6 }
 0x14c   : > { %v1134_v63 = vcombine.low %v1078_v59, %v1094_v3  ;;  %v1135_v10 = vcombine.high %v1078_v59, %v1094_v3  ;;  %6011 = vst [vmem:[#allocation47_spill] sm:$0xff] %v4190_v28  ;;  %6012 = vst [vmem:[#allocation48_spill] sm:$0xff] %v4194_v18  ;;  %v1150_v59 = vcombine.low %v1085_v45, %v1101_v37 }
 0x14d   : > { %v1222_v3 = vcombine.low %v3852_v55, %v347_v36  ;;  %v1214_v5 = vrot.slane %v1206_v17, %v3871_v22 }
 0x14e   : > { %1580 = vrot.lane.b32.xlu1 %v4159_v32, %s3621_s24  ;;  %1578 = vrot.lane.b32.xlu0 %v4163_v21, %s3621_s24  ;;  %v1142_v57 = vrot.slane %v1134_v63, %v3883_v23  ;;  %v1149_v53 = vrot.slane %v1135_v10, %v3883_v23  ;;  %v1190_v63 = vcombine.low %v6016_v34, %v6015_v11 }
 0x14f   : > { %v1151_v10 = vcombine.high %v1085_v45, %v1101_v37  ;;  %v1126_v21 = vrot.slane %v1118_v15, %v3883_v23  ;;  %v1223_v45 = vcombine.high %v3852_v55, %v347_v36  ;;  %v1207_v15 = vcombine.high %v6018_v60, %v6017_v6 }
 0x150   : > { %v4204_v12 = vcombine.high %v1110_v51, %v1142_v57  ;;  %v4207_v58 = vcombine.low %v1110_v51, %v1142_v57  ;;  %v1230_v57 = vrot.slane %v1222_v3, %v3871_v22  ;;  %v4221_v51 = vcombine.high %v1117_v2, %v1149_v53 }
 0x151   : > { %v1175_v55 = vcombine.high %v6020_v52, %v6019_v43 }
 0x152   : > { %1584 = vrot.lane.b32.xlu1 %v4173_v0, %s3621_s24  ;;  %1582 = vrot.lane.b32.xlu0 %v4178_v29, %s3621_s24  ;;  %6013 = vst [vmem:[#allocation49_spill] sm:$0xff] %v4204_v12  ;;  %6014 = vst [vmem:[#allocation50_spill] sm:$0xff] %v4207_v58  ;;  %v4224_v29 = vcombine.low %v1117_v2, %v1149_v53  ;;  %v1119_v0 = vcombine.high %v1053_v20, %v1069_v44 }
 0x153   : > { %6021 = vst [vmem:[#allocation12_spill] sm:$0xff] %v4221_v51  ;;  %v1165_v20 = vrot.slane %v1151_v10, %v3883_v23  ;;  %v1191_v53 = vcombine.high %v6016_v34, %v6015_v11  ;;  %v349_v34 = vpop.permute.xlu1 %348 }
 0x154   : > { %6022 = vst [vmem:[#allocation8_spill] sm:$0xff] %v4224_v29 }
 0x155   : > { %v1205_v60 = vrot.slane %v1191_v53, %v3871_v22  ;;  %v6032_v53 = vld [vmem:[#allocation11_spill] sm:$0xff] }
 0x156   : > { %1588 = vrot.lane.b32.xlu1 %v4190_v28, %s3621_s24  ;;  %1586 = vrot.lane.b32.xlu0 %v4194_v18, %s3621_s24  ;;  %v1174_v18 = vcombine.low %v6020_v52, %v6019_v43  ;;  %v1158_v28 = vrot.slane %v1150_v59, %v3883_v23  ;;  %v1270_v59 = vcombine.low %v1214_v5, %v1230_v57  ;;  %v6027_v52 = vld [vmem:[#allocation15_spill] sm:$0xff] }
 0x157   : > { %v1189_v43 = vrot.slane %v1175_v55, %v3871_v22  ;;  %v1358_v10 = vcombine.low %v6027_v52, %v349_v34  ;;  %v6034_v55 = vld [vmem:[#allocation13_spill] sm:$0xff] }
 0x158   : > { %v1182_v37 = vrot.slane %v1174_v18, %v3871_v22  ;;  %v4235_v3 = vcombine.high %v1126_v21, %v1158_v28  ;;  %v4238_v44 = vcombine.low %v1126_v21, %v1158_v28  ;;  %v1133_v18 = vrot.slane %v1119_v0, %v3883_v23 }
 0x159   : > { %v1237_v21 = vrot.slane %v1223_v45, %v3871_v22  ;;  %v1271_v28 = vcombine.high %v1214_v5, %v1230_v57  ;;  %v1278_v11 = vrot.slane %v1270_v59, %v3883_v23  ;;  %v1221_v0 = vrot.slane %v1207_v15, %v3871_v22  ;;  %v6033_v15 = vld [vmem:[#allocation7_spill] sm:$0xff] }
 0x15a   : > { %1592 = vrot.lane.b32.xlu1 %v4204_v12, %s3621_s24  ;;  %1590 = vrot.lane.b32.xlu0 %v4207_v58, %s3621_s24  ;;  %v1198_v12 = vrot.slane %v1190_v63, %v3871_v22  ;;  %6023 = vst [vmem:[#allocation16_spill] sm:$0xff] %v4235_v3  ;;  %6024 = vst [vmem:[#allocation14_spill] sm:$0xff] %v4238_v44  ;;  %v4252_v36 = vcombine.high %v1133_v18, %v1165_v20 }
 0x15b   : > { %v4255_v6 = vcombine.low %v1133_v18, %v1165_v20  ;;  %v1286_v57 = vcombine.low %v1221_v0, %v1237_v21  ;;  %v1285_v45 = vrot.slane %v1271_v28, %v3883_v23  ;;  %v1254_v18 = vcombine.low %v1189_v43, %v1205_v60 }
 0x15c   : > { %v1238_v63 = vcombine.low %v1182_v37, %v1198_v12  ;;  %6025 = vst [vmem:[#allocation10_spill] sm:$0xff] %v4252_v36  ;;  %v1239_v17 = vcombine.high %v1182_v37, %v1198_v12  ;;  %v6029_v12 = vld [vmem:[#allocation9_spill] sm:$0xff]  ;;  %v1366_v28 = vrot.slane %v1358_v10, %v3871_v22  ;;  %v1255_v58 = vcombine.high %v1189_v43, %v1205_v60 }
 0x15d   : > { %6026 = vst [vmem:[#allocation6_spill] sm:$0xff] %v4255_v6  ;;  %v6030_v37 = vld [vmem:[#allocation5_spill] sm:$0xff] }
 0x15e   : > { %1596 = vrot.lane.b32.xlu1 %v4221_v51, %s3621_s24  ;;  %1594 = vrot.lane.b32.xlu0 %v4224_v29, %s3621_s24  ;;  %v1246_v2 = vrot.slane %v1238_v63, %v3883_v23  ;;  %v1310_v59 = vcombine.low %v6030_v37, %v6029_v12  ;;  %v1326_v63 = vcombine.low %v6033_v15, %v6032_v53 }
 0x15f   : > { %v1311_v60 = vcombine.high %v6030_v37, %v6029_v12 }
 0x160   : > { %v4266_v5 = vcombine.high %v1246_v2, %v1278_v11  ;;  %v4271_v20 = vcombine.low %v1246_v2, %v1278_v11  ;;  %v1294_v2 = vrot.slane %v1286_v57, %v3883_v23  ;;  %v1334_v51 = vrot.slane %v1326_v63, %v3871_v22 }
 0x162   : > { %1600 = vrot.lane.b32.xlu1 %v4235_v3, %s3621_s24  ;;  %1598 = vrot.lane.b32.xlu0 %v4238_v44, %s3621_s24  ;;  %6028 = vst [vmem:[#allocation15_spill] sm:$0xff] %v4266_v5  ;;  %6031 = vst [vmem:[#allocation9_spill] sm:$0xff] %v4271_v20  ;;  %v1287_v44 = vcombine.high %v1221_v0, %v1237_v21  ;;  %v1318_v3 = vrot.slane %v1310_v59, %v3871_v22 }
 0x163   : > { %v1359_v21 = vcombine.high %v6027_v52, %v349_v34  ;;  %v1269_v34 = vrot.slane %v1255_v58, %v3883_v23  ;;  %v1325_v59 = vrot.slane %v1311_v60, %v3871_v22 }
 0x164   : > { %v1374_v57 = vcombine.low %v1318_v3, %v1334_v51 }
 0x166   : > { %1604 = vrot.lane.b32.xlu1 %v4252_v36, %s3621_s24  ;;  %1602 = vrot.lane.b32.xlu0 %v4255_v6, %s3621_s24  ;;  %v1342_v36 = vcombine.low %v6034_v55, %v3878_v30  ;;  %v1253_v6 = vrot.slane %v1239_v17, %v3883_v23  ;;  %v1262_v17 = vrot.slane %v1254_v18, %v3883_v23 }
 0x167   : > { %v1382_v58 = vrot.slane %v1374_v57, %v3883_v23 }
 0x168   : > { %v4283_v11 = vcombine.high %v1253_v6, %v1285_v45  ;;  %v4287_v29 = vcombine.low %v1253_v6, %v1285_v45  ;;  %v4297_v10 = vcombine.high %v1262_v17, %v1294_v2  ;;  %v1301_v6 = vrot.slane %v1287_v44, %v3883_v23 }
 0x169   : > { %v4302_v43 = vcombine.low %v1262_v17, %v1294_v2  ;;  %v1343_v45 = vcombine.high %v6034_v55, %v3878_v30  ;;  %v1373_v44 = vrot.slane %v1359_v21, %v3871_v22 }
 0x16a   : > { %1608 = vrot.lane.b32.xlu1 %v4266_v5, %s3621_s24  ;;  %1606 = vrot.lane.b32.xlu0 %v4271_v20, %s3621_s24  ;;  %6035 = vst [vmem:[#allocation5_spill] sm:$0xff] %v4283_v11  ;;  %6036 = vst [vmem:[#allocation11_spill] sm:$0xff] %v4287_v29  ;;  %v1350_v5 = vrot.slane %v1342_v36, %v3871_v22  ;;  %v1327_v36 = vcombine.high %v6033_v15, %v6032_v53 }
 0x16b   : > { %6037 = vst [vmem:[#allocation7_spill] sm:$0xff] %v4297_v10  ;;  %6038 = vst [vmem:[#allocation13_spill] sm:$0xff] %v4302_v43  ;;  %v4314_v12 = vcombine.high %v1269_v34, %v1301_v6  ;;  %v4318_v53 = vcombine.low %v1269_v34, %v1301_v6  ;;  %v1375_v15 = vcombine.high %v1318_v3, %v1334_v51 }
 0x16c   : > { %v1406_v0 = vcombine.low %v1350_v5, %v1366_v28  ;;  %v1407_v52 = vcombine.high %v1350_v5, %v1366_v28  ;;  %v1341_v30 = vrot.slane %v1327_v36, %v3871_v22  ;;  %v1357_v63 = vrot.slane %v1343_v45, %v3871_v22 }
 0x16d   : > { %6039 = vst [vmem:[#allocation51_spill] sm:$0xff] %v4314_v12  ;;  %6040 = vst [vmem:[#allocation52_spill] sm:$0xff] %v4318_v53  ;;  %v1389_v22 = vrot.slane %v1375_v15, %v3883_v23 }
 0x16e   : > { %1612 = vrot.lane.b32.xlu1 %v4283_v11, %s3621_s24  ;;  %1610 = vrot.lane.b32.xlu0 %v4287_v29, %s3621_s24  ;;  %v1414_v37 = vrot.slane %v1406_v0, %v3883_v23  ;;  %v1422_v5 = vcombine.low %v1357_v63, %v1373_v44  ;;  %v1421_v55 = vrot.slane %v1407_v52, %v3883_v23 }
 0x16f   : > { %v1390_v2 = vcombine.low %v1325_v59, %v1341_v30  ;;  %v1423_v51 = vcombine.high %v1357_v63, %v1373_v44  ;;  %v1391_v36 = vcombine.high %v1325_v59, %v1341_v30 }
 0x170   : > { %v4327_v18 = vcombine.high %v1382_v58, %v1414_v37  ;;  %v4330_v28 = vcombine.low %v1382_v58, %v1414_v37  ;;  %v4337_v17 = vcombine.high %v1389_v22, %v1421_v55  ;;  %v1430_v21 = vrot.slane %v1422_v5, %v3883_v23 }
 0x171   : > { %v4343_v60 = vcombine.low %v1389_v22, %v1421_v55  ;;  %v1398_v45 = vrot.slane %v1390_v2, %v3883_v23  ;;  %v1437_v37 = vrot.slane %v1423_v51, %v3883_v23  ;;  %v1405_v58 = vrot.slane %v1391_v36, %v3883_v23 }
 0x172   : > { %1616 = vrot.lane.b32.xlu1 %v4297_v10, %s3621_s24  ;;  %1614 = vrot.lane.b32.xlu0 %v4302_v43, %s3621_s24  ;;  %6041 = vst [vmem:[#allocation53_spill] sm:$0xff] %v4327_v18  ;;  %6042 = vst [vmem:[#allocation54_spill] sm:$0xff] %v4330_v28 }
 0x173   : > { %6043 = vst [vmem:[#allocation55_spill] sm:$0xff] %v4337_v17  ;;  %6044 = vst [vmem:[#allocation56_spill] sm:$0xff] %v4343_v60  ;;  %v4355_v52 = vcombine.high %v1398_v45, %v1430_v21  ;;  %v4361_v15 = vcombine.low %v1398_v45, %v1430_v21  ;;  %v4373_v2 = vcombine.high %v1405_v58, %v1437_v37 }
 0x175   : > { %6045 = vst [vmem:[#allocation57_spill] sm:$0xff] %v4355_v52  ;;  %6047 = vst [vmem:[#allocation59_spill] sm:$0xff] %v4361_v15 }
 0x176   : > { %1620 = vrot.lane.b32.xlu1 %v4314_v12, %s3621_s24  ;;  %1618 = vrot.lane.b32.xlu0 %v4318_v53, %s3621_s24  ;;  %6049 = vst [vmem:[#allocation61_spill] sm:$0xff] %v4373_v2 }
 0x17a   : > { %1624 = vrot.lane.b32.xlu1 %v4327_v18, %s3621_s24  ;;  %1622 = vrot.lane.b32.xlu0 %v4330_v28, %s3621_s24 }
 0x17c   : > { %v1513_v3 = vpop.permute.xlu1 %1512  ;;  %v1511_v6 = vpop.permute.xlu0 %1510 }
 0x17d   : > { %v4341_v0 = vadd.f32 %v1513_v3, %v3894_v56  ;;  %v4346_v57 = vadd.f32 %v1511_v6, %v3896_v4  ;;  %v4378_v3 = vcombine.low %v1405_v58, %v1437_v37 }
 0x17e   : > { %1628 = vrot.lane.b32.xlu1 %v4337_v17, %s3621_s24  ;;  %1626 = vrot.lane.b32.xlu0 %v4343_v60, %s3621_s24 }
 0x17f   : > { %6051 = vst [vmem:[#allocation63_spill] sm:$0xff] %v4378_v3 }
 0x180   : > { %v1517_v44 = vpop.permute.xlu1 %1516  ;;  %v1515_v30 = vpop.permute.xlu0 %1514 }
 0x181   : > { %v4359_v59 = vadd.f32 %v1517_v44, %v3911_v62  ;;  %v4364_v63 = vadd.f32 %v1515_v30, %v3915_v38 }
 0x182   : > { %1632 = vrot.lane.b32.xlu1 %v4355_v52, %s3621_s24  ;;  %1630 = vrot.lane.b32.xlu0 %v4361_v15, %s3621_s24 }
 0x183   : > { %6046 = vst [vmem:[#allocation58_spill] sm:$0xff] %v4359_v59  ;;  %6048 = vst [vmem:[#allocation60_spill] sm:$0xff] %v4364_v63 }
 0x184   : > { %v1521_v55 = vpop.permute.xlu1 %1520  ;;  %v1519_v51 = vpop.permute.xlu0 %1518 }
 0x185   : > { %v4376_v22 = vadd.f32 %v1521_v55, %v3925_v41  ;;  %v4381_v21 = vadd.f32 %v1519_v51, %v3930_v33  ;;  %v5823_v51 = vmov 0  }
 0x186   : > { %1636 = vrot.lane.b32.xlu1 %v4373_v2, %s3621_s24  ;;  %1634 = vrot.lane.b32.xlu0 %v4378_v3, %s3621_s24 }
 0x187   : > { %6050 = vst [vmem:[#allocation62_spill] sm:$0xff] %v4376_v22  ;;  %6052 = vst [vmem:[#allocation64_spill] sm:$0xff] %v4381_v21  ;;  %3524 = vset.pattern.permute.xlu1 %v5823_v51  ;;  %3523 = vset.pattern.permute.xlu0 %v5823_v51 }
 0x188   : > { %v1525_v6 = vpop.permute.xlu1 %1524  ;;  %v1523_v45 = vpop.permute.xlu0 %1522 }
 0x189   : > { %v4390_v36 = vadd.f32 %v1525_v6, %v3942_v24  ;;  %v4393_v44 = vadd.f32 %v1523_v45, %v3946_v47 }
 0x18a   : > { %1768 = vrot.lane.b32.xlu1 %v3894_v56, %s3622_s25  ;;  %1766 = vrot.lane.b32.xlu0 %v3896_v4, %s3622_s25 }
 0x18c   : > { %v1529_v30 = vpop.permute.xlu1 %1528  ;;  %v1527_v55 = vpop.permute.xlu0 %1526 }
 0x18d   : > { %v4402_v58 = vadd.f32 %v1529_v30, %v3956_v13  ;;  %v4407_v6 = vadd.f32 %v1527_v55, %v3959_v49 }
 0x18e   : > { %1772 = vrot.lane.b32.xlu1 %v3911_v62, %s3622_s25  ;;  %1770 = vrot.lane.b32.xlu0 %v3915_v38, %s3622_s25 }
 0x18f   : > { %6053 = vst [vmem:[#allocation65_spill] sm:$0xff] %v4402_v58  ;;  %6054 = vst [vmem:[#allocation66_spill] sm:$0xff] %v4407_v6  ;;  %v6061_v58 = vld [vmem:[#allocation25_spill] sm:$0xff] }
 0x190   : > { %v1533_v30 = vpop.permute.xlu1 %1532  ;;  %v1531_v5 = vpop.permute.xlu0 %1530 }
 0x191   : > { %v4416_v23 = vadd.f32 %v1533_v30, %v3973_v25  ;;  %v4419_v37 = vadd.f32 %v1531_v5, %v3976_v48 }
 0x192   : > { %1776 = vrot.lane.b32.xlu1 %v3925_v41, %s3622_s25  ;;  %1774 = vrot.lane.b32.xlu0 %v3930_v33, %s3622_s25 }
 0x193   : > { %6055 = vst [vmem:[#allocation67_spill] sm:$0xff] %v4416_v23  ;;  %6056 = vst [vmem:[#allocation68_spill] sm:$0xff] %v4419_v37 }
 0x194   : > { %v1537_v51 = vpop.permute.xlu1 %1536  ;;  %v1535_v34 = vpop.permute.xlu0 %1534 }
 0x195   : > { %v4428_v45 = vadd.f32 %v1537_v51, %v3987_v39  ;;  %v4431_v30 = vadd.f32 %v1535_v34, %v3990_v40  ;;  %v6060_v51 = vld [vmem:[#allocation24_spill] sm:$0xff] }
 0x196   : > { %1780 = vrot.lane.b32.xlu1 %v3942_v24, %s3622_s25  ;;  %1778 = vrot.lane.b32.xlu0 %v3946_v47, %s3622_s25 }
 0x197   : > { %6057 = vst [vmem:[#allocation69_spill] sm:$0xff] %v4428_v45  ;;  %6058 = vst [vmem:[#allocation70_spill] sm:$0xff] %v4431_v30 }
 0x198   : > { %v1541_v38 = vpop.permute.xlu1 %1540  ;;  %v1539_v62 = vpop.permute.xlu0 %1538 }
 0x199   : > { %v4440_v55 = vadd.f32 %v1541_v38, %v4004_v54  ;;  %v4443_v23 = vadd.f32 %v1539_v62, %v6060_v51 }
 0x19a   : > { %1784 = vrot.lane.b32.xlu1 %v3956_v13, %s3622_s25  ;;  %1782 = vrot.lane.b32.xlu0 %v3959_v49, %s3622_s25 }
 0x19b   : > { %6059 = vst [vmem:[#allocation71_spill] sm:$0xff] %v4440_v55 }
 0x19c   : > { %v1545_v37 = vpop.permute.xlu1 %1544  ;;  %v1543_v45 = vpop.permute.xlu0 %1542 }
 0x19d   : > { %v4452_v5 = vadd.f32 %v1545_v37, %v6061_v58  ;;  %v4455_v38 = vadd.f32 %v1543_v45, %v4023_v8 }
 0x19e   : > { %1788 = vrot.lane.b32.xlu1 %v3973_v25, %s3622_s25  ;;  %1786 = vrot.lane.b32.xlu0 %v3976_v48, %s3622_s25 }
 0x19f   : > { %6062 = vst [vmem:[#allocation72_spill] sm:$0xff] %v4452_v5  ;;  %6063 = vst [vmem:[#allocation73_spill] sm:$0xff] %v4455_v38 }
 0x1a0   : > { %v1549_v49 = vpop.permute.xlu1 %1548  ;;  %v1547_v13 = vpop.permute.xlu0 %1546 }
 0x1a1   : > { %v4464_v34 = vadd.f32 %v1549_v49, %v4035_v9  ;;  %v4467_v37 = vadd.f32 %v1547_v13, %v4039_v16 }
 0x1a2   : > { %1792 = vrot.lane.b32.xlu1 %v3987_v39, %s3622_s25  ;;  %1790 = vrot.lane.b32.xlu0 %v3990_v40, %s3622_s25 }
 0x1a4   : > { %v1553_v55 = vpop.permute.xlu1 %1552  ;;  %v1551_v5 = vpop.permute.xlu0 %1550 }
 0x1a5   : > { %v4476_v62 = vadd.f32 %v1553_v55, %v4049_v14  ;;  %v4479_v49 = vadd.f32 %v1551_v5, %v4054_v27 }
 0x1a6   : > { %1796 = vrot.lane.b32.xlu1 %v4004_v54, %s3622_s25  ;;  %1794 = vrot.lane.b32.xlu0 %v6060_v51, %s3622_s25 }
 0x1a7   : > { %6064 = vst [vmem:[#allocation74_spill] sm:$0xff] %v4476_v62  ;;  %6065 = vst [vmem:[#allocation75_spill] sm:$0xff] %v4479_v49 }
 0x1a8   : > { %v1557_v40 = vpop.permute.xlu1 %1556  ;;  %v1555_v39 = vpop.permute.xlu0 %1554 }
 0x1a9   : > { %v4488_v45 = vadd.f32 %v1557_v40, %v4066_v26  ;;  %v4491_v55 = vadd.f32 %v1555_v39, %v4070_v19 }
 0x1aa   : > { %1800 = vrot.lane.b32.xlu1 %v6061_v58, %s3622_s25  ;;  %1798 = vrot.lane.b32.xlu0 %v4023_v8, %s3622_s25 }
 0x1ac   : > { %v1561_v51 = vpop.permute.xlu1 %1560  ;;  %v1559_v62 = vpop.permute.xlu0 %1558 }
 0x1ad   : > { %v4500_v13 = vadd.f32 %v1561_v51, %v4080_v1  ;;  %v4503_v40 = vadd.f32 %v1559_v62, %v4083_v61 }
 0x1ae   : > { %1804 = vrot.lane.b32.xlu1 %v4035_v9, %s3622_s25  ;;  %1802 = vrot.lane.b32.xlu0 %v4039_v16, %s3622_s25 }
 0x1af   : > { %6066 = vst [vmem:[#allocation76_spill] sm:$0xff] %v4500_v13  ;;  %6067 = vst [vmem:[#allocation77_spill] sm:$0xff] %v4503_v40 }
 0x1b0   : > { %v1565_v8 = vpop.permute.xlu1 %1564  ;;  %v1563_v58 = vpop.permute.xlu0 %1562 }
 0x1b1   : > { %v4512_v5 = vadd.f32 %v1565_v8, %v4097_v31  ;;  %v4515_v51 = vadd.f32 %v1563_v58, %v4100_v50 }
 0x1b2   : > { %1808 = vrot.lane.b32.xlu1 %v4049_v14, %s3622_s25  ;;  %1806 = vrot.lane.b32.xlu0 %v4054_v27, %s3622_s25 }
 0x1b3   : > { %6068 = vst [vmem:[#allocation78_spill] sm:$0xff] %v4512_v5 }
 0x1b4   : > { %v1569_v16 = vpop.permute.xlu1 %1568  ;;  %v1567_v9 = vpop.permute.xlu0 %1566 }
 0x1b5   : > { %v4524_v39 = vadd.f32 %v1569_v16, %v4111_v46  ;;  %v4527_v8 = vadd.f32 %v1567_v9, %v4114_v42  ;;  %v6072_v16 = vld [vmem:[#allocation40_spill] sm:$0xff] }
 0x1b6   : > { %1812 = vrot.lane.b32.xlu1 %v4066_v26, %s3622_s25  ;;  %1810 = vrot.lane.b32.xlu0 %v4070_v19, %s3622_s25  ;;  %v6074_v26 = vld [vmem:[#allocation41_spill] sm:$0xff] }
 0x1b7   : > { %6069 = vst [vmem:[#allocation79_spill] sm:$0xff] %v4524_v39  ;;  %6070 = vst [vmem:[#allocation80_spill] sm:$0xff] %v4527_v8 }
 0x1b8   : > { %v1573_v27 = vpop.permute.xlu1 %1572  ;;  %v1571_v14 = vpop.permute.xlu0 %1570 }
 0x1b9   : > { %v4536_v62 = vadd.f32 %v1573_v27, %v4128_v7  ;;  %v4539_v5 = vadd.f32 %v1571_v14, %v6072_v16 }
 0x1ba   : > { %1816 = vrot.lane.b32.xlu1 %v4080_v1, %s3622_s25  ;;  %1814 = vrot.lane.b32.xlu0 %v4083_v61, %s3622_s25 }
 0x1bb   : > { %6071 = vst [vmem:[#allocation81_spill] sm:$0xff] %v4536_v62  ;;  %6073 = vst [vmem:[#allocation82_spill] sm:$0xff] %v4539_v5 }
 0x1bc   : > { %v1577_v19 = vpop.permute.xlu1 %1576  ;;  %v1575_v39 = vpop.permute.xlu0 %1574 }
 0x1bd   : > { %v4548_v58 = vadd.f32 %v1577_v19, %v6074_v26  ;;  %v4551_v27 = vadd.f32 %v1575_v39, %v4147_v35  ;;  %v6078_v19 = vld [vmem:[#allocation44_spill] sm:$0xff] }
 0x1be   : > { %1820 = vrot.lane.b32.xlu1 %v4097_v31, %s3622_s25  ;;  %1818 = vrot.lane.b32.xlu0 %v4100_v50, %s3622_s25  ;;  %v6080_v31 = vld [vmem:[#allocation45_spill] sm:$0xff] }
 0x1bf   : > { %6075 = vst [vmem:[#allocation83_spill] sm:$0xff] %v4548_v58  ;;  %6076 = vst [vmem:[#allocation84_spill] sm:$0xff] %v4551_v27 }
 0x1c0   : > { %v1581_v61 = vpop.permute.xlu1 %1580  ;;  %v1579_v1 = vpop.permute.xlu0 %1578 }
 0x1c1   : > { %v4560_v9 = vadd.f32 %v1581_v61, %v4159_v32  ;;  %v4563_v62 = vadd.f32 %v1579_v1, %v6078_v19  ;;  %v6082_v61 = vld [vmem:[#allocation46_spill] sm:$0xff] }
 0x1c2   : > { %1824 = vrot.lane.b32.xlu1 %v4111_v46, %s3622_s25  ;;  %1822 = vrot.lane.b32.xlu0 %v4114_v42, %s3622_s25  ;;  %v6084_v46 = vld [vmem:[#allocation47_spill] sm:$0xff] }
 0x1c3   : > { %6077 = vst [vmem:[#allocation85_spill] sm:$0xff] %v4560_v9  ;;  %6079 = vst [vmem:[#allocation86_spill] sm:$0xff] %v4563_v62 }
 0x1c4   : > { %v1585_v50 = vpop.permute.xlu1 %1584  ;;  %v1583_v58 = vpop.permute.xlu0 %1582 }
 0x1c5   : > { %v4572_v14 = vadd.f32 %v1585_v50, %v6080_v31  ;;  %v4575_v27 = vadd.f32 %v1583_v58, %v6082_v61  ;;  %v6086_v50 = vld [vmem:[#allocation48_spill] sm:$0xff] }
 0x1c6   : > { %1828 = vrot.lane.b32.xlu1 %v4128_v7, %s3622_s25  ;;  %1826 = vrot.lane.b32.xlu0 %v6072_v16, %s3622_s25  ;;  %v6088_v7 = vld [vmem:[#allocation49_spill] sm:$0xff] }
 0x1c7   : > { %6081 = vst [vmem:[#allocation87_spill] sm:$0xff] %v4572_v14  ;;  %6083 = vst [vmem:[#allocation88_spill] sm:$0xff] %v4575_v27 }
 0x1c8   : > { %v1589_v42 = vpop.permute.xlu1 %1588  ;;  %v1587_v9 = vpop.permute.xlu0 %1586 }
 0x1c9   : > { %v4584_v39 = vadd.f32 %v1589_v42, %v6084_v46  ;;  %v4587_v62 = vadd.f32 %v1587_v9, %v6086_v50  ;;  %v6090_v42 = vld [vmem:[#allocation50_spill] sm:$0xff] }
 0x1ca   : > { %1832 = vrot.lane.b32.xlu1 %v6074_v26, %s3622_s25  ;;  %1830 = vrot.lane.b32.xlu0 %v4147_v35, %s3622_s25  ;;  %v6092_v26 = vld [vmem:[#allocation12_spill] sm:$0xff] }
 0x1cb   : > { %6085 = vst [vmem:[#allocation89_spill] sm:$0xff] %v4584_v39  ;;  %6087 = vst [vmem:[#allocation90_spill] sm:$0xff] %v4587_v62 }
 0x1cc   : > { %v1593_v16 = vpop.permute.xlu1 %1592  ;;  %v1591_v14 = vpop.permute.xlu0 %1590 }
 0x1cd   : > { %v4596_v1 = vadd.f32 %v1593_v16, %v6088_v7  ;;  %v4599_v27 = vadd.f32 %v1591_v14, %v6090_v42  ;;  %v6094_v16 = vld [vmem:[#allocation8_spill] sm:$0xff] }
 0x1ce   : > { %1836 = vrot.lane.b32.xlu1 %v4159_v32, %s3622_s25  ;;  %1834 = vrot.lane.b32.xlu0 %v6078_v19, %s3622_s25  ;;  %v6096_v32 = vld [vmem:[#allocation16_spill] sm:$0xff] }
 0x1cf   : > { %6089 = vst [vmem:[#allocation91_spill] sm:$0xff] %v4596_v1  ;;  %6091 = vst [vmem:[#allocation92_spill] sm:$0xff] %v4599_v27 }
 0x1d0   : > { %v1597_v35 = vpop.permute.xlu1 %1596  ;;  %v1595_v39 = vpop.permute.xlu0 %1594 }
 0x1d1   : > { %v4608_v58 = vadd.f32 %v1597_v35, %v6092_v26  ;;  %v4611_v62 = vadd.f32 %v1595_v39, %v6094_v16  ;;  %v6098_v35 = vld [vmem:[#allocation14_spill] sm:$0xff] }
 0x1d2   : > { %1840 = vrot.lane.b32.xlu1 %v6080_v31, %s3622_s25  ;;  %1838 = vrot.lane.b32.xlu0 %v6082_v61, %s3622_s25  ;;  %v6100_v31 = vld [vmem:[#allocation10_spill] sm:$0xff] }
 0x1d3   : > { %6093 = vst [vmem:[#allocation93_spill] sm:$0xff] %v4608_v58  ;;  %6095 = vst [vmem:[#allocation94_spill] sm:$0xff] %v4611_v62 }
 0x1d4   : > { %v1601_v19 = vpop.permute.xlu1 %1600  ;;  %v1599_v1 = vpop.permute.xlu0 %1598 }
 0x1d5   : > { %v4620_v9 = vadd.f32 %v1601_v19, %v6096_v32  ;;  %v4623_v27 = vadd.f32 %v1599_v1, %v6098_v35  ;;  %v6101_v19 = vld [vmem:[#allocation6_spill] sm:$0xff] }
 0x1d6   : > { %1844 = vrot.lane.b32.xlu1 %v6084_v46, %s3622_s25  ;;  %1842 = vrot.lane.b32.xlu0 %v6086_v50, %s3622_s25  ;;  %v6102_v46 = vld [vmem:[#allocation15_spill] sm:$0xff] }
 0x1d7   : > { %6097 = vst [vmem:[#allocation95_spill] sm:$0xff] %v4620_v9  ;;  %6099 = vst [vmem:[#allocation96_spill] sm:$0xff] %v4623_v27 }
 0x1d8   : > { %v1605_v61 = vpop.permute.xlu1 %1604  ;;  %v1603_v58 = vpop.permute.xlu0 %1602 }
 0x1d9   : > { %v4632_v14 = vadd.f32 %v1605_v61, %v6100_v31  ;;  %v4635_v62 = vadd.f32 %v1603_v58, %v6101_v19 }
 0x1da   : > { %1848 = vrot.lane.b32.xlu1 %v6088_v7, %s3622_s25  ;;  %1846 = vrot.lane.b32.xlu0 %v6090_v42, %s3622_s25 }
 0x1dc   : > { %v1609_v50 = vpop.permute.xlu1 %1608  ;;  %v1607_v9 = vpop.permute.xlu0 %1606 }
 0x1dd   : > { %v4644_v39 = vadd.f32 %v1609_v50, %v6102_v46  ;;  %v4647_v61 = vadd.f32 %v1607_v9, %v4271_v20 }
 0x1de   : > { %1852 = vrot.lane.b32.xlu1 %v6092_v26, %s3622_s25  ;;  %1850 = vrot.lane.b32.xlu0 %v6094_v16, %s3622_s25 }
 0x1e0   : > { %v1613_v42 = vpop.permute.xlu1 %1612  ;;  %v1611_v7 = vpop.permute.xlu0 %1610 }
 0x1e1   : > { %v4656_v1 = vadd.f32 %v1613_v42, %v4283_v11  ;;  %v4659_v50 = vadd.f32 %v1611_v7, %v4287_v29 }
 0x1e2   : > { %1856 = vrot.lane.b32.xlu1 %v6096_v32, %s3622_s25  ;;  %1854 = vrot.lane.b32.xlu0 %v6098_v35, %s3622_s25 }
 0x1e4   : > { %v1617_v16 = vpop.permute.xlu1 %1616  ;;  %v1615_v26 = vpop.permute.xlu0 %1614 }
 0x1e5   : > { %v4668_v58 = vadd.f32 %v1617_v16, %v4297_v10  ;;  %v4671_v42 = vadd.f32 %v1615_v26, %v4302_v43 }
 0x1e6   : > { %1860 = vrot.lane.b32.xlu1 %v6100_v31, %s3622_s25  ;;  %1858 = vrot.lane.b32.xlu0 %v6101_v19, %s3622_s25 }
 0x1e7   : > { %6103 = vst [vmem:[#allocation97_spill] sm:$0xff] %v4668_v58  ;;  %6104 = vst [vmem:[#allocation98_spill] sm:$0xff] %v4671_v42 }
 0x1e8   : > { %v1621_v35 = vpop.permute.xlu1 %1620  ;;  %v1619_v32 = vpop.permute.xlu0 %1618 }
 0x1e9   : > { %v4680_v9 = vadd.f32 %v1621_v35, %v4314_v12  ;;  %v4683_v16 = vadd.f32 %v1619_v32, %v4318_v53 }
 0x1ea   : > { %1864 = vrot.lane.b32.xlu1 %v6102_v46, %s3622_s25  ;;  %1862 = vrot.lane.b32.xlu0 %v4271_v20, %s3622_s25 }
 0x1ec   : > { %v1625_v19 = vpop.permute.xlu1 %1624  ;;  %v1623_v31 = vpop.permute.xlu0 %1622 }
 0x1ed   : > { %v4692_v7 = vadd.f32 %v1625_v19, %v4327_v18  ;;  %v4695_v35 = vadd.f32 %v1623_v31, %v4330_v28 }
 0x1ee   : > { %1868 = vrot.lane.b32.xlu1 %v4283_v11, %s3622_s25  ;;  %1866 = vrot.lane.b32.xlu0 %v4287_v29, %s3622_s25 }
 0x1ef   : > { %6105 = vst [vmem:[#allocation99_spill] sm:$0xff] %v4692_v7  ;;  %6106 = vst [vmem:[#allocation100_spill] sm:$0xff] %v4695_v35 }
 0x1f0   : > { %v1629_v20 = vpop.permute.xlu1 %1628  ;;  %v1627_v46 = vpop.permute.xlu0 %1626 }
 0x1f1   : > { %v4704_v26 = vadd.f32 %v1629_v20, %v4337_v17  ;;  %v4707_v19 = vadd.f32 %v1627_v46, %v4343_v60 }
 0x1f2   : > { %1872 = vrot.lane.b32.xlu1 %v4297_v10, %s3622_s25  ;;  %1870 = vrot.lane.b32.xlu0 %v4302_v43, %s3622_s25 }
 0x1f4   : > { %v1633_v29 = vpop.permute.xlu1 %1632  ;;  %v1631_v11 = vpop.permute.xlu0 %1630 }
 0x1f5   : > { %v4716_v32 = vadd.f32 %v1633_v29, %v4355_v52  ;;  %v4719_v20 = vadd.f32 %v1631_v11, %v4361_v15 }
 0x1f6   : > { %1876 = vrot.lane.b32.xlu1 %v4314_v12, %s3622_s25  ;;  %1874 = vrot.lane.b32.xlu0 %v4318_v53, %s3622_s25 }
 0x1f7   : > { %6107 = vst [vmem:[#allocation101_spill] sm:$0xff] %v4716_v32  ;;  %6108 = vst [vmem:[#allocation102_spill] sm:$0xff] %v4719_v20 }
 0x1f8   : > { %v1637_v43 = vpop.permute.xlu1 %1636  ;;  %v1635_v10 = vpop.permute.xlu0 %1634 }
 0x1f9   : > { %v4728_v31 = vadd.f32 %v1637_v43, %v4373_v2  ;;  %v4731_v29 = vadd.f32 %v1635_v10, %v4378_v3  ;;  %v2023_v10 = vadd.f32 %v4359_v59, %v4364_v63  ;;  %v2025_v59 = vadd.f32 %v4390_v36, %v4393_v44 }
 0x1fa   : > { %1880 = vrot.lane.b32.xlu1 %v4327_v18, %s3622_s25  ;;  %1878 = vrot.lane.b32.xlu0 %v4330_v28, %s3622_s25  ;;  %v6145_v18 = vld [vmem:[#allocation89_spill] sm:$0xff] }
 0x1fc   : > { %v1769_v53 = vpop.permute.xlu1 %1768  ;;  %v1767_v12 = vpop.permute.xlu0 %1766 }
 0x1fd   : > { %v4740_v46 = vsub.f32 %v3894_v56, %v1769_v53  ;;  %v4743_v43 = vsub.f32 %v3896_v4, %v1767_v12 }
 0x1fe   : > { %1884 = vrot.lane.b32.xlu1 %v4337_v17, %s3622_s25  ;;  %1882 = vrot.lane.b32.xlu0 %v4343_v60, %s3622_s25  ;;  %v6140_v60 = vld [vmem:[#allocation32_spill] sm:$0xff] }
 0x1ff   : > { %6109 = vst [vmem:[#allocation103_spill] sm:$0xff] %v4740_v46  ;;  %6110 = vst [vmem:[#allocation104_spill] sm:$0xff] %v4743_v43  ;;  %v6141_v17 = vld [vmem:[#allocation88_spill] sm:$0xff] }
 0x200   : > { %v4751_v28 = vpop.permute.xlu1 %1772  ;;  %v4753_v11 = vpop.permute.xlu0 %1770 }
 0x201   : > { %6111 = vst [vmem:[#allocation105_spill] sm:$0xff] %v4751_v28  ;;  %6112 = vst [vmem:[#allocation106_spill] sm:$0xff] %v4753_v11  ;;  %v2024_v11 = vadd.f32 %v4376_v22, %v4381_v21 }
 0x202   : > { %1888 = vrot.lane.b32.xlu1 %v4355_v52, %s3622_s25  ;;  %1886 = vrot.lane.b32.xlu0 %v4361_v15, %s3622_s25 }
 0x204   : > { %v1777_v56 = vpop.permute.xlu1 %1776  ;;  %v1775_v12 = vpop.permute.xlu0 %1774 }
 0x205   : > { %v4760_v4 = vsub.f32 %v3925_v41, %v1777_v56  ;;  %v4763_v53 = vsub.f32 %v3930_v33, %v1775_v12  ;;  %v2022_v41 = vadd.f32 %v4341_v0, %v4346_v57 }
 0x206   : > { %1892 = vrot.lane.b32.xlu1 %v4373_v2, %s3622_s25  ;;  %1890 = vrot.lane.b32.xlu0 %v4378_v3, %s3622_s25 }
 0x207   : > { %6113 = vst [vmem:[#allocation107_spill] sm:$0xff] %v4763_v53 }
 0x208   : > { %v1781_v52 = vpop.permute.xlu1 %1780  ;;  %v1779_v33 = vpop.permute.xlu0 %1778 }
 0x209   : > { %v4776_v56 = vsub.f32 %v3942_v24, %v1781_v52  ;;  %v4779_v12 = vsub.f32 %v3946_v47, %v1779_v33  ;;  %v6116_v24 = vld [vmem:[#allocation65_spill] sm:$0xff] }
 0x20a   : > { %2186 = vperm.xlu1 %3524, %v2023_v10   ;;  %2183 = vperm.xlu0 %3523, %v2022_v41   ;;  %v2026_v47 = vadd.f32 %v6116_v24, %v4407_v6  ;;  %v6117_v10 = vld [vmem:[#allocation68_spill] sm:$0xff]  ;;  %v6118_v41 = vld [vmem:[#allocation67_spill] sm:$0xff] }
 0x20b   : > { %v2027_v33 = vadd.f32 %v6118_v41, %v6117_v10  ;;  %v6121_v24 = vld [vmem:[#allocation71_spill] sm:$0xff] }
 0x20c   : > { %v4785_v15 = vpop.permute.xlu1 %1784  ;;  %v4789_v28 = vpop.permute.xlu0 %1782 }
 0x20d   : > { %6114 = vst [vmem:[#allocation108_spill] sm:$0xff] %v4785_v15  ;;  %6115 = vst [vmem:[#allocation109_spill] sm:$0xff] %v4789_v28  ;;  %v6119_v28 = vld [vmem:[#allocation69_spill] sm:$0xff]  ;;  %v2029_v15 = vadd.f32 %v6121_v24, %v4443_v23 }
 0x20e   : > { %2189 = vperm.xlu1 %3524, %v2024_v11   ;;  %2192 = vperm.xlu0 %3523, %v2025_v59   ;;  %v2028_v11 = vadd.f32 %v6119_v28, %v4431_v30  ;;  %v6124_v59 = vld [vmem:[#allocation24_spill] sm:$0xff]  ;;  %v6125_v28 = vld [vmem:[#allocation74_spill] sm:$0xff] }
 0x210   : > { %v1789_v52 = vpop.permute.xlu1 %1788  ;;  %v1787_v63 = vpop.permute.xlu0 %1786 }
 0x211   : > { %v4796_v21 = vsub.f32 %v3973_v25, %v1789_v52  ;;  %v4799_v22 = vsub.f32 %v3976_v48, %v1787_v63  ;;  %v6123_v25 = vld [vmem:[#allocation72_spill] sm:$0xff] }
 0x212   : > { %2195 = vperm.xlu1 %3524, %v2026_v47   ;;  %2198 = vperm.xlu0 %3523, %v2027_v33   ;;  %v2030_v48 = vadd.f32 %v6123_v25, %v4455_v38  ;;  %v2031_v47 = vadd.f32 %v4464_v34, %v4467_v37  ;;  %v2033_v25 = vadd.f32 %v4488_v45, %v4491_v55 }
 0x214   : > { %v4805_v6 = vpop.permute.xlu1 %1792  ;;  %v4809_v3 = vpop.permute.xlu0 %1790 }
 0x215   : > { %6120 = vst [vmem:[#allocation68_spill] sm:$0xff] %v4805_v6  ;;  %6122 = vst [vmem:[#allocation67_spill] sm:$0xff] %v4809_v3 }
 0x216   : > { %2201 = vperm.xlu1 %3524, %v2028_v11   ;;  %2204 = vperm.xlu0 %3523, %v2029_v15   ;;  %v2032_v11 = vadd.f32 %v6125_v28, %v4479_v49  ;;  %v6130_v49 = vld [vmem:[#allocation28_spill] sm:$0xff] }
 0x218   : > { %v1797_v63 = vpop.permute.xlu1 %1796  ;;  %v1795_v33 = vpop.permute.xlu0 %1794 }
 0x219   : > { %v4816_v52 = vsub.f32 %v4004_v54, %v1797_v63  ;;  %v4819_v30 = vsub.f32 %v6124_v59, %v1795_v33  ;;  %v2034_v54 = vadd.f32 %v4500_v13, %v4503_v40  ;;  %v6133_v13 = vld [vmem:[#allocation81_spill] sm:$0xff] }
 0x21a   : > { %2207 = vperm.xlu1 %3524, %v2030_v48   ;;  %2210 = vperm.xlu0 %3523, %v2031_v47   ;;  %v6128_v48 = vld [vmem:[#allocation78_spill] sm:$0xff]  ;;  %v6129_v47 = vld [vmem:[#allocation27_spill] sm:$0xff] }
 0x21b   : > { %v2035_v63 = vadd.f32 %v6128_v48, %v4515_v51 }
 0x21c   : > { %v4825_v38 = vpop.permute.xlu1 %1800  ;;  %v4829_v3 = vpop.permute.xlu0 %1798 }
 0x21d   : > { %6126 = vst [vmem:[#allocation71_spill] sm:$0xff] %v4825_v38  ;;  %6127 = vst [vmem:[#allocation24_spill] sm:$0xff] %v4829_v3  ;;  %v6131_v3 = vld [vmem:[#allocation79_spill] sm:$0xff]  ;;  %v2037_v38 = vadd.f32 %v6133_v13, %v4539_v5  ;;  %v6153_v13 = vld [vmem:[#allocation36_spill] sm:$0xff] }
 0x21e   : > { %2213 = vperm.xlu1 %3524, %v2032_v11   ;;  %2216 = vperm.xlu0 %3523, %v2033_v25   ;;  %v2036_v11 = vadd.f32 %v6131_v3, %v4527_v8  ;;  %v6139_v8 = vld [vmem:[#allocation31_spill] sm:$0xff] }
 0x220   : > { %v1805_v59 = vpop.permute.xlu1 %1804  ;;  %v1803_v15 = vpop.permute.xlu0 %1802 }
 0x221   : > { %v4836_v33 = vsub.f32 %v6129_v47, %v1805_v59  ;;  %v4839_v28 = vsub.f32 %v6130_v49, %v1803_v15  ;;  %v6135_v59 = vld [vmem:[#allocation84_spill] sm:$0xff]  ;;  %v6136_v49 = vld [vmem:[#allocation83_spill] sm:$0xff]  ;;  %v6138_v47 = vld [vmem:[#allocation85_spill] sm:$0xff] }
 0x222   : > { %2219 = vperm.xlu1 %3524, %v2034_v54   ;;  %2222 = vperm.xlu0 %3523, %v2035_v63   ;;  %v2038_v15 = vadd.f32 %v6136_v49, %v6135_v59  ;;  %v6137_v63 = vld [vmem:[#allocation86_spill] sm:$0xff] }
 0x223   : > { %v2039_v2 = vadd.f32 %v6138_v47, %v6137_v63  ;;  %v6144_v49 = vld [vmem:[#allocation90_spill] sm:$0xff] }
 0x224   : > { %v4845_v40 = vpop.permute.xlu1 %1808  ;;  %v4849_v6 = vpop.permute.xlu0 %1806  ;;  %v2041_v63 = vadd.f32 %v6145_v18, %v6144_v49 }
 0x225   : > { %6132 = vst [vmem:[#allocation78_spill] sm:$0xff] %v4845_v40  ;;  %6134 = vst [vmem:[#allocation27_spill] sm:$0xff] %v4849_v6  ;;  %v6142_v6 = vld [vmem:[#allocation87_spill] sm:$0xff] }
 0x226   : > { %2225 = vperm.xlu1 %3524, %v2036_v11   ;;  %2228 = vperm.xlu0 %3523, %v2037_v38   ;;  %v2040_v11 = vadd.f32 %v6142_v6, %v6141_v17  ;;  %v6151_v17 = vld [vmem:[#allocation35_spill] sm:$0xff] }
 0x228   : > { %v1813_v54 = vpop.permute.xlu1 %1812  ;;  %v1811_v25 = vpop.permute.xlu0 %1810 }
 0x229   : > { %v4856_v3 = vsub.f32 %v6139_v8, %v1813_v54  ;;  %v4859_v40 = vsub.f32 %v6140_v60, %v1811_v25  ;;  %v6147_v8 = vld [vmem:[#allocation92_spill] sm:$0xff]  ;;  %v6148_v60 = vld [vmem:[#allocation91_spill] sm:$0xff]  ;;  %v6150_v54 = vld [vmem:[#allocation93_spill] sm:$0xff] }
 0x22a   : > { %2231 = vperm.xlu1 %3524, %v2038_v15   ;;  %2234 = vperm.xlu0 %3523, %v2039_v2   ;;  %v2042_v25 = vadd.f32 %v6148_v60, %v6147_v8  ;;  %v6149_v2 = vld [vmem:[#allocation94_spill] sm:$0xff]  ;;  %v2045_v60 = vadd.f32 %v4632_v14, %v4635_v62 }
 0x22b   : > { %v2043_v5 = vadd.f32 %v6150_v54, %v6149_v2  ;;  %v6156_v2 = vld [vmem:[#allocation37_spill] sm:$0xff] }
 0x22c   : > { %v4865_v59 = vpop.permute.xlu1 %1816  ;;  %v4869_v47 = vpop.permute.xlu0 %1814 }
 0x22d   : > { %6143 = vst [vmem:[#allocation28_spill] sm:$0xff] %v4865_v59  ;;  %6146 = vst [vmem:[#allocation31_spill] sm:$0xff] %v4869_v47  ;;  %v6155_v47 = vld [vmem:[#allocation95_spill] sm:$0xff] }
 0x22e   : > { %2237 = vperm.xlu1 %3524, %v2040_v11   ;;  %2240 = vperm.xlu0 %3523, %v2041_v63   ;;  %v2044_v11 = vadd.f32 %v6155_v47, %v4623_v27  ;;  %v6158_v63 = vld [vmem:[#allocation39_spill] sm:$0xff] }
 0x230   : > { %v1821_v15 = vpop.permute.xlu1 %1820  ;;  %v1819_v38 = vpop.permute.xlu0 %1818 }
 0x231   : > { %v4876_v6 = vsub.f32 %v6151_v17, %v1821_v15  ;;  %v4879_v59 = vsub.f32 %v6153_v13, %v1819_v38  ;;  %v6157_v15 = vld [vmem:[#allocation38_spill] sm:$0xff]  ;;  %v2046_v13 = vadd.f32 %v4644_v39, %v4647_v61 }
 0x232   : > { %2243 = vperm.xlu1 %3524, %v2042_v25   ;;  %2246 = vperm.xlu0 %3523, %v2043_v5   ;;  %v2047_v25 = vadd.f32 %v4656_v1, %v4659_v50 }
 0x233   : > { %6152 = vst [vmem:[#allocation32_spill] sm:$0xff] %v4876_v6  ;;  %6154 = vst [vmem:[#allocation89_spill] sm:$0xff] %v4879_v59 }
 0x234   : > { %v1825_v8 = vpop.permute.xlu1 %1824  ;;  %v1823_v17 = vpop.permute.xlu0 %1822 }
 0x235   : > { %v4888_v54 = vsub.f32 %v6156_v2, %v1825_v8  ;;  %v4891_v49 = vsub.f32 %v6157_v15, %v1823_v17  ;;  %v6160_v2 = vld [vmem:[#allocation40_spill] sm:$0xff]  ;;  %v2049_v15 = vadd.f32 %v4680_v9, %v4683_v16 }
 0x236   : > { %2249 = vperm.xlu1 %3524, %v2044_v11   ;;  %2252 = vperm.xlu0 %3523, %v2045_v60   ;;  %v2048_v60 = vadd.f32 %v4668_v58, %v4671_v42  ;;  %v6164_v11 = vld [vmem:[#allocation44_spill] sm:$0xff] }
 0x238   : > { %v1829_v38 = vpop.permute.xlu1 %1828  ;;  %v1827_v8 = vpop.permute.xlu0 %1826 }
 0x239   : > { %v4900_v27 = vsub.f32 %v6158_v63, %v1829_v38  ;;  %v4903_v47 = vsub.f32 %v6160_v2, %v1827_v8  ;;  %v2050_v63 = vadd.f32 %v4692_v7, %v4695_v35  ;;  %v2051_v38 = vadd.f32 %v4704_v26, %v4707_v19 }
 0x23a   : > { %2255 = vperm.xlu1 %3524, %v2046_v13   ;;  %2258 = vperm.xlu0 %3523, %v2047_v25   ;;  %v6162_v25 = vld [vmem:[#allocation43_spill] sm:$0xff]  ;;  %v2053_v7 = vadd.f32 %v4728_v31, %v4731_v29 }
 0x23b   : > { %6159 = vst [vmem:[#allocation35_spill] sm:$0xff] %v4900_v27  ;;  %6161 = vst [vmem:[#allocation36_spill] sm:$0xff] %v4903_v47 }
 0x23c   : > { %v4909_v17 = vpop.permute.xlu1 %1832  ;;  %v4913_v5 = vpop.permute.xlu0 %1830 }
 0x23e   : > { %2261 = vperm.xlu1 %3524, %v2048_v60   ;;  %2264 = vperm.xlu0 %3523, %v2049_v15   ;;  %v2052_v60 = vadd.f32 %v4716_v32, %v4719_v20  ;;  %v5946_v15 = vmov 1   ;;  %v6168_v32 = vsub.f32 %v4341_v0, %v4346_v57 }
 0x240   : > { %v1837_v13 = vpop.permute.xlu1 %1836  ;;  %v1835_v2 = vpop.permute.xlu0 %1834 }
 0x241   : > { %v4920_v8 = vsub.f32 %v6162_v25, %v1837_v13  ;;  %v4923_v42 = vsub.f32 %v6164_v11, %v1835_v2  ;;  %v2086_v11 = vadd.f32 %v4740_v46, %v4743_v43  ;;  %v6167_v2 = vld [vmem:[#allocation48_spill] sm:$0xff] }
 0x242   : > { %2267 = vperm.xlu1 %3524, %v2050_v63   ;;  %2270 = vperm.xlu0 %3523, %v2051_v38   ;;  %v6166_v63 = vld [vmem:[#allocation47_spill] sm:$0xff] }
 0x243   : > { %6163 = vst [vmem:[#allocation37_spill] sm:$0xff] %v4920_v8  ;;  %6165 = vst [vmem:[#allocation38_spill] sm:$0xff] %v4923_v42 }
 0x244   : > { %v4929_v35 = vpop.permute.xlu1 %1840  ;;  %v4933_v58 = vpop.permute.xlu0 %1838 }
 0x246   : > { %2273 = vperm.xlu1 %3524, %v2052_v60   ;;  %2276 = vperm.xlu0 %3523, %v2053_v7  }
 0x248   : > { %v1845_v13 = vpop.permute.xlu1 %1844  ;;  %v1843_v25 = vpop.permute.xlu0 %1842 }
 0x249   : > { %v4938_v38 = vsub.f32 %v6166_v63, %v1845_v13  ;;  %v4941_v20 = vsub.f32 %v6167_v2, %v1843_v25  ;;  %v2088_v13 = vadd.f32 %v4760_v4, %v4763_v53  ;;  %v6169_v63 = vld [vmem:[#allocation49_spill] sm:$0xff]  ;;  %v6170_v2 = vld [vmem:[#allocation50_spill] sm:$0xff] }
 0x24a   : > { %3525 = vset.pattern.permute.xlu1 %v5946_v15  ;;  %2778 = vperm.xlu0 %3523, %v6168_v32   ;;  %v6171_v15 = vsub.f32 %v4390_v36, %v4393_v44  ;;  %v2089_v32 = vadd.f32 %v4776_v56, %v4779_v12 }
 0x24b   : > { %2485 = vperm.xlu1 %3525, %v2086_v11   ;;  %v6172_v11 = vld [vmem:[#allocation12_spill] sm:$0xff] }
 0x24c   : > { %v1849_v60 = vpop.permute.xlu1 %1848  ;;  %v1847_v25 = vpop.permute.xlu0 %1846 }
 0x24d   : > { %v4952_v43 = vsub.f32 %v6169_v63, %v1849_v60  ;;  %v4955_v46 = vsub.f32 %v6170_v2, %v1847_v25  ;;  %v6173_v63 = vld [vmem:[#allocation8_spill] sm:$0xff]  ;;  %v6175_v25 = vsub.f32 %v6118_v41, %v6117_v10 }
 0x24e   : > { %2787 = vperm.xlu0 %3523, %v6171_v15   ;;  %v2091_v15 = vadd.f32 %v4796_v21, %v4799_v22 }
 0x24f   : > { %2491 = vperm.xlu1 %3525, %v2088_v13   ;;  %v6176_v13 = vld [vmem:[#allocation16_spill] sm:$0xff] }
 0x250   : > { %v1853_v57 = vpop.permute.xlu1 %1852  ;;  %v1851_v60 = vpop.permute.xlu0 %1850 }
 0x251   : > { %v4965_v7 = vsub.f32 %v6172_v11, %v1853_v57  ;;  %v4968_v53 = vsub.f32 %v6173_v63, %v1851_v60  ;;  %v6177_v11 = vld [vmem:[#allocation14_spill] sm:$0xff]  ;;  %v6178_v60 = vsub.f32 %v6121_v24, %v4443_v23 }
 0x252   : > { %2793 = vperm.xlu0 %3523, %v6175_v25   ;;  %v6179_v63 = vld [vmem:[#allocation10_spill] sm:$0xff] }
 0x253   : > { %6174 = vst [vmem:[#allocation39_spill] sm:$0xff] %v4968_v53  ;;  %2494 = vperm.xlu1 %3525, %v2089_v32   ;;  %v2093_v32 = vadd.f32 %v4816_v52, %v4819_v30 }
 0x254   : > { %v1857_v44 = vpop.permute.xlu1 %1856  ;;  %v1855_v57 = vpop.permute.xlu0 %1854 }
 0x255   : > { %v4978_v2 = vsub.f32 %v6176_v13, %v1857_v44  ;;  %v4981_v0 = vsub.f32 %v6177_v11, %v1855_v57  ;;  %v6181_v13 = vld [vmem:[#allocation6_spill] sm:$0xff]  ;;  %v6183_v57 = vsub.f32 %v4464_v34, %v4467_v37  ;;  %v2097_v34 = vadd.f32 %v4856_v3, %v4859_v40  ;;  %v6185_v37 = vld [vmem:[#allocation5_spill] sm:$0xff] }
 0x256   : > { %2799 = vperm.xlu0 %3523, %v6178_v60   ;;  %v6184_v60 = vsub.f32 %v4488_v45, %v4491_v55  ;;  %v6197_v45 = vld [vmem:[#allocation85_spill] sm:$0xff] }
 0x257   : > { %2500 = vperm.xlu1 %3525, %v2091_v15   ;;  %v2095_v15 = vadd.f32 %v4836_v33, %v4839_v28 }
 0x258   : > { %v1861_v41 = vpop.permute.xlu1 %1860  ;;  %v1859_v44 = vpop.permute.xlu0 %1858 }
 0x259   : > { %v4991_v25 = vsub.f32 %v6179_v63, %v1861_v41  ;;  %v4994_v36 = vsub.f32 %v6181_v13, %v1859_v44  ;;  %v6187_v44 = vld [vmem:[#allocation11_spill] sm:$0xff] }
 0x25a   : > { %2805 = vperm.xlu0 %3523, %v6183_v57   ;;  %v6189_v57 = vsub.f32 %v6128_v48, %v4515_v51  ;;  %v2101_v51 = vadd.f32 %v4900_v27, %v4903_v47  ;;  %v6193_v48 = vld [vmem:[#allocation51_spill] sm:$0xff] }
 0x25b   : > { %6180 = vst [vmem:[#allocation40_spill] sm:$0xff] %v4991_v25  ;;  %6182 = vst [vmem:[#allocation43_spill] sm:$0xff] %v4994_v36  ;;  %2506 = vperm.xlu1 %3525, %v2093_v32  }
 0x25c   : > { %v5001_v24 = vpop.permute.xlu1 %1864  ;;  %v5005_v11 = vpop.permute.xlu0 %1862 }
 0x25e   : > { %2811 = vperm.xlu0 %3523, %v6184_v60  }
 0x25f   : > { %2512 = vperm.xlu1 %3525, %v2095_v15   ;;  %v2099_v15 = vadd.f32 %v4876_v6, %v4879_v59  ;;  %v6198_v59 = vld [vmem:[#allocation86_spill] sm:$0xff] }
 0x260   : > { %v1869_v41 = vpop.permute.xlu1 %1868  ;;  %v1867_v63 = vpop.permute.xlu0 %1866  ;;  %v6199_v6 = vsub.f32 %v6197_v45, %v6198_v59  ;;  %v2105_v45 = vadd.f32 %v4938_v38, %v4941_v20 }
 0x261   : > { %v5013_v32 = vsub.f32 %v6185_v37, %v1869_v41  ;;  %v5016_v13 = vsub.f32 %v6187_v44, %v1867_v63  ;;  %v6190_v41 = vld [vmem:[#allocation81_spill] sm:$0xff]  ;;  %v6191_v37 = vld [vmem:[#allocation82_spill] sm:$0xff] }
 0x262   : > { %2817 = vperm.xlu0 %3523, %v6189_v57   ;;  %v6192_v10 = vsub.f32 %v6190_v41, %v6191_v37  ;;  %v6195_v57 = vld [vmem:[#allocation52_spill] sm:$0xff]  ;;  %v2103_v41 = vadd.f32 %v4920_v8, %v4923_v42  ;;  %v6200_v37 = vld [vmem:[#allocation53_spill] sm:$0xff] }
 0x263   : > { %6186 = vst [vmem:[#allocation44_spill] sm:$0xff] %v5013_v32  ;;  %6188 = vst [vmem:[#allocation47_spill] sm:$0xff] %v5016_v13  ;;  %2518 = vperm.xlu1 %3525, %v2097_v34  }
 0x264   : > { %v5023_v55 = vpop.permute.xlu1 %1872  ;;  %v5027_v60 = vpop.permute.xlu0 %1870 }
 0x266   : > { %2823 = vperm.xlu0 %3523, %v6192_v10  }
 0x267   : > { %2524 = vperm.xlu1 %3525, %v2099_v15  }
 0x268   : > { %v1877_v63 = vpop.permute.xlu1 %1876  ;;  %v1875_v44 = vpop.permute.xlu0 %1874 }
 0x269   : > { %v5035_v34 = vsub.f32 %v6193_v48, %v1877_v63  ;;  %v5038_v23 = vsub.f32 %v6195_v57, %v1875_v44  ;;  %v6201_v48 = vld [vmem:[#allocation54_spill] sm:$0xff] }
 0x26a   : > { %2829 = vperm.xlu0 %3523, %v6199_v6   ;;  %v6202_v44 = vld [vmem:[#allocation90_spill] sm:$0xff]  ;;  %v6230_v6 = vmov 1  }
 0x26b   : > { %6194 = vst [vmem:[#allocation48_spill] sm:$0xff] %v5035_v34  ;;  %6196 = vst [vmem:[#allocation49_spill] sm:$0xff] %v5038_v23  ;;  %2530 = vperm.xlu1 %3525, %v2101_v51   ;;  %v6203_v57 = vsub.f32 %v6145_v18, %v6202_v44  ;;  %v6204_v51 = vld [vmem:[#allocation55_spill] sm:$0xff]  ;;  %v2107_v44 = vadd.f32 %v4965_v7, %v4968_v53  ;;  %v6216_v18 = vsub.f32 %v4656_v1, %v4659_v50  ;;  %v6219_v1 = vld [vmem:[#allocation17_spill] sm:$0xff] }
 0x26c   : > { %v1881_v15 = vpop.permute.xlu1 %1880  ;;  %v1879_v63 = vpop.permute.xlu0 %1878 }
 0x26d   : > { %v5048_v47 = vsub.f32 %v6200_v37, %v1881_v15  ;;  %v5051_v27 = vsub.f32 %v6201_v48, %v1879_v63  ;;  %v6206_v37 = vld [vmem:[#allocation56_spill] sm:$0xff]  ;;  %v6208_v63 = vld [vmem:[#allocation93_spill] sm:$0xff]  ;;  %v6209_v48 = vld [vmem:[#allocation94_spill] sm:$0xff] }
 0x26e   : > { %2835 = vperm.xlu0 %3523, %v6203_v57   ;;  %v6210_v8 = vsub.f32 %v6208_v63, %v6209_v48  ;;  %v6214_v63 = vld [vmem:[#allocation63_spill] sm:$0xff] }
 0x26f   : > { %2536 = vperm.xlu1 %3525, %v2103_v41  }
 0x270   : > { %v1885_v59 = vpop.permute.xlu1 %1884  ;;  %v1883_v15 = vpop.permute.xlu0 %1882 }
 0x271   : > { %v5061_v10 = vsub.f32 %v6204_v51, %v1885_v59  ;;  %v5064_v42 = vsub.f32 %v6206_v37, %v1883_v15  ;;  %v6211_v59 = vsub.f32 %v4632_v14, %v4635_v62  ;;  %v2111_v14 = vadd.f32 %v5013_v32, %v5016_v13  ;;  %v6258_v32 = vld [vmem:[#allocation70_spill] sm:$0xff] }
 0x272   : > { %2841 = vperm.xlu0 %3523, %v6210_v8   ;;  %v2109_v8 = vadd.f32 %v4991_v25, %v4994_v36  ;;  %v6247_v36 = vld [vmem:[#allocation29_spill] sm:$0xff] }
 0x273   : > { %6205 = vst [vmem:[#allocation50_spill] sm:$0xff] %v5061_v10  ;;  %6207 = vst [vmem:[#allocation12_spill] sm:$0xff] %v5064_v42  ;;  %2542 = vperm.xlu1 %3525, %v2105_v45   ;;  %v6212_v45 = vld [vmem:[#allocation61_spill] sm:$0xff] }
 0x274   : > { %v5071_v41 = vpop.permute.xlu1 %1888  ;;  %v5075_v57 = vpop.permute.xlu0 %1886 }
 0x276   : > { %2847 = vperm.xlu0 %3523, %v6211_v59  }
 0x277   : > { %2548 = vperm.xlu1 %3525, %v2107_v44   ;;  %v6217_v44 = vlaneseq }
 0x278   : > { %v1893_v51 = vpop.permute.xlu1 %1892  ;;  %v1891_v37 = vpop.permute.xlu0 %1890 }
 0x279   : > { %v5083_v15 = vsub.f32 %v6212_v45, %v1893_v51  ;;  %v5086_v48 = vsub.f32 %v6214_v63, %v1891_v37  ;;  %v2279_v59 = vand.u32 127, %v6217_v44  ;;  %v6218_v51 = vsub.f32 %v4680_v9, %v4683_v16  ;;  %v6221_v63 = vld [vmem:[#allocation105_spill] sm:$0xff]  ;;  %v6222_v9 = vld [vmem:[#allocation18_spill] sm:$0xff]  ;;  %v6224_v44 = vld [vmem:[#allocation19_spill] sm:$0xff] }
 0x27a   : > { %2853 = vperm.xlu0 %3523, %v6216_v18   ;;  %v2113_v45 = vadd.f32 %v5035_v34, %v5038_v23  ;;  %v6220_v18 = vsub.f32 %v4704_v26, %v4707_v19  ;;  %v5111_v16 = vsub.f32 %v6222_v9, %v6221_v63  ;;  %v6225_v26 = vsub.f32 %v4728_v31, %v4731_v29  ;;  %v6227_v63 = vld [vmem:[#allocation20_spill] sm:$0xff]  ;;  %v6228_v9 = vld [vmem:[#allocation109_spill] sm:$0xff]  ;;  %v6248_v23 = vld [vmem:[#allocation27_spill] sm:$0xff] }
 0x27b   : > { %6213 = vst [vmem:[#allocation8_spill] sm:$0xff] %v5083_v15  ;;  %6215 = vst [vmem:[#allocation16_spill] sm:$0xff] %v5086_v48  ;;  %2554 = vperm.xlu1 %3525, %v2109_v8   ;;  %v5102_v50 = vsub.s32 %v2279_v59, %v6219_v1  ;;  %v2115_v8 = vadd.f32 %v5061_v10, %v5064_v42  ;;  %v2117_v19 = vadd.f32 %v5083_v15, %v5086_v48  ;;  %v6229_v31 = vld [vmem:[#allocation21_spill] sm:$0xff]  ;;  %v6235_v15 = vmov 0   ;;  %v6236_v10 = vld [vmem:[#allocation58_spill] sm:$0xff] }
 0x27c   : > { %v5133_v29 = vsub.f32 %v6229_v31, %v6228_v9  ;;  %v6232_v9 = vld [vmem:[#allocation22_spill] sm:$0xff] }
 0x27d   : > { %v6249_v34 = vld [vmem:[#allocation30_spill] sm:$0xff] }
 0x27e   : > { %2859 = vperm.xlu0 %3523, %v6218_v51  }
 0x27f   : > { %2560 = vperm.xlu1 %3525, %v2111_v14   ;;  %v6223_v14 = vld [vmem:[#allocation106_spill] sm:$0xff] }
 0x280   : > { %v5115_v51 = vsub.f32 %v6224_v44, %v6223_v14 }
 0x282   : > { %2865 = vperm.xlu0 %3523, %v6220_v18   ;;  %v2087_v18 = vadd.f32 %v5111_v16, %v5115_v51 }
 0x283   : > { %2566 = vperm.xlu1 %3525, %v2113_v45  }
 0x285   : > { %v2187_v37 = vpop.permute.xlu1 %2186  ;;  %v2184_v62 = vpop.permute.xlu0 %2183 }
 0x286   : > { %v2287_v59 = vrot.slane %v2187_v37, %v5102_v50  ;;  %v2283_v1 = vrot.slane %v2184_v62, %v5102_v50  ;;  %2871 = vperm.xlu0 %3523, %v6225_v26   ;;  %v6226_v37 = vld [vmem:[#allocation108_spill] sm:$0xff] }
 0x287   : > { %2572 = vperm.xlu1 %3525, %v2115_v8   ;;  %v5129_v62 = vsub.f32 %v6227_v63, %v6226_v37 }
 0x288   : > { %v2409_v44 = vsel %vm2408_vm0, %v2287_v59, %v2283_v1  ;;  %v6233_v59 = vld [vmem:[#allocation67_spill] sm:$0xff] }
 0x289   : > { %v2190_v45 = vpop.permute.xlu1 %2189  ;;  %v2193_v14 = vpop.permute.xlu0 %2192  ;;  %v2090_v63 = vadd.f32 %v5129_v62, %v5133_v29  ;;  %v6234_v1 = vld [vmem:[#allocation23_spill] sm:$0xff] }
 0x28a   : > { %v2291_v8 = vrot.slane %v2190_v45, %v5102_v50  ;;  %v2295_v26 = vrot.slane %v2193_v14, %v5102_v50  ;;  %3527 = vset.pattern.permute.xlu0 %v6230_v6  ;;  %v6231_v45 = vld [vmem:[#allocation68_spill] sm:$0xff]  ;;  %v5151_v14 = vsub.f32 %v6234_v1, %v6233_v59 }
 0x28b   : > { %2578 = vperm.xlu1 %3525, %v2117_v19   ;;  %2488 = vperm.xlu0 %3527, %v2087_v18   ;;  %v5147_v31 = vsub.f32 %v6232_v9, %v6231_v45  ;;  %v6237_v45 = vld [vmem:[#allocation60_spill] sm:$0xff] }
 0x28c   : > { %v2411_v48 = vsel %vm2410_vm1, %v2291_v8, %v2409_v44  ;;  %v6238_v9 = vsub.f32 %v6236_v10, %v6237_v45 }
 0x28d   : > { %v2196_v37 = vpop.permute.xlu1 %2195  ;;  %v2199_v8 = vpop.permute.xlu0 %2198  ;;  %v2413_v18 = vsel %vm2412_vm2, %v2295_v26, %v2411_v48  ;;  %v6239_v48 = vld [vmem:[#allocation71_spill] sm:$0xff]  ;;  %v6240_v26 = vld [vmem:[#allocation25_spill] sm:$0xff] }
 0x28e   : > { %v2299_v19 = vrot.slane %v2196_v37, %v5102_v50  ;;  %v2303_v44 = vrot.slane %v2199_v8, %v5102_v50  ;;  %v2092_v37 = vadd.f32 %v5147_v31, %v5151_v14  ;;  %v5165_v1 = vsub.f32 %v6240_v26, %v6239_v48  ;;  %v6242_v8 = vld [vmem:[#allocation26_spill] sm:$0xff]  ;;  %v6244_v26 = vld [vmem:[#allocation64_spill] sm:$0xff] }
 0x28f   : > { %3526 = vset.pattern.permute.xlu1 %v6235_v15  ;;  %2497 = vperm.xlu0 %3527, %v2090_v63   ;;  %v6241_v15 = vld [vmem:[#allocation24_spill] sm:$0xff]  ;;  %v6243_v48 = vld [vmem:[#allocation62_spill] sm:$0xff] }
 0x290   : > { %v2415_v42 = vsel %vm2414_vm3, %v2299_v19, %v2413_v18  ;;  %2781 = vperm.xlu1 %3526, %v6238_v9   ;;  %v5169_v19 = vsub.f32 %v6242_v8, %v6241_v15  ;;  %v6245_v15 = vsub.f32 %v6243_v48, %v6244_v26 }
 0x291   : > { %v2202_v59 = vpop.permute.xlu1 %2201  ;;  %v2205_v18 = vpop.permute.xlu0 %2204  ;;  %v2417_v10 = vsel %vm2416_vm4, %v2303_v44, %v2415_v42  ;;  %v6246_v44 = vld [vmem:[#allocation78_spill] sm:$0xff] }
 0x292   : > { %v2307_v63 = vrot.slane %v2202_v59, %v5102_v50  ;;  %v2311_v45 = vrot.slane %v2205_v18, %v5102_v50  ;;  %v2094_v42 = vadd.f32 %v5165_v1, %v5169_v19  ;;  %v5188_v25 = vsub.f32 %v6247_v36, %v6246_v44  ;;  %v6254_v44 = vld [vmem:[#allocation33_spill] sm:$0xff] }
 0x293   : > { %2503 = vperm.xlu0 %3527, %v2092_v37   ;;  %v5192_v18 = vsub.f32 %v6249_v34, %v6248_v23  ;;  %v6255_v34 = vld [vmem:[#allocation31_spill] sm:$0xff] }
 0x294   : > { %v2419_v9 = vsel %vm2418_vm5, %v2307_v63, %v2417_v10  ;;  %2784 = vperm.xlu1 %3526, %v6245_v15   ;;  %v6253_v15 = vld [vmem:[#allocation28_spill] sm:$0xff] }
 0x295   : > { %v2421_v59 = vsel %vm2420_vm6, %v2311_v45, %v2419_v9  ;;  %v2208_v8 = vpop.permute.xlu1 %2207  ;;  %v2211_v37 = vpop.permute.xlu0 %2210  ;;  %v6250_v45 = vld [vmem:[#allocation65_spill] sm:$0xff]  ;;  %v6251_v9 = vld [vmem:[#allocation66_spill] sm:$0xff]  ;;  %v2096_v36 = vadd.f32 %v5188_v25, %v5192_v18  ;;  %v5205_v23 = vsub.f32 %v6254_v44, %v6253_v15 }
 0x296   : > { %2448 = vst.msk [vmem:[%s5176_s28] sm:$0xff] %vm2447_vm7, %v2421_v59  ;;  %v2315_v63 = vrot.slane %v2208_v8, %v5102_v50  ;;  %v2319_v10 = vrot.slane %v2211_v37, %v5102_v50  ;;  %v6252_v48 = vsub.f32 %v6250_v45, %v6251_v9  ;;  %v6256_v59 = vld [vmem:[#allocation34_spill] sm:$0xff] }
 0x297   : > { %2509 = vperm.xlu0 %3527, %v2094_v42   ;;  %v5209_v13 = vsub.f32 %v6256_v59, %v6255_v34 }
 0x298   : > { %2790 = vperm.xlu1 %3526, %v6252_v48   ;;  %v2422_v42 = vsel %vm2408_vm0, %v2319_v10, %v2315_v63  ;;  %v6257_v48 = vld [vmem:[#allocation69_spill] sm:$0xff] }
 0x299   : > { %v2214_v26 = vpop.permute.xlu1 %2213  ;;  %v2217_v37 = vpop.permute.xlu0 %2216  ;;  %v6259_v53 = vsub.f32 %v6257_v48, %v6258_v32  ;;  %v2098_v44 = vadd.f32 %v5205_v23, %v5209_v13 }
 0x29a   : > { %v2323_v8 = vrot.slane %v2214_v26, %v5102_v50  ;;  %v2327_v45 = vrot.slane %v2217_v37, %v5102_v50 }
 0x29b   : > { %2515 = vperm.xlu0 %3527, %v2096_v36   ;;  %v6261_v36 = vld [vmem:[#allocation73_spill] sm:$0xff] }
 0x29c   : > { %v2423_v9 = vsel %vm2410_vm1, %v2323_v8, %v2422_v42  ;;  %2796 = vperm.xlu1 %3526, %v6259_v53   ;;  %v6260_v8 = vld [vmem:[#allocation72_spill] sm:$0xff]  ;;  %v2100_v53 = vadd.f32 %v4888_v54, %v4891_v49  ;;  %v6263_v42 = vld [vmem:[#allocation41_spill] sm:$0xff] }
 0x29d   : > { %v2220_v15 = vpop.permute.xlu1 %2219  ;;  %v2223_v59 = vpop.permute.xlu0 %2222  ;;  %v2424_v26 = vsel %vm2412_vm2, %v2327_v45, %v2423_v9  ;;  %v6262_v37 = vsub.f32 %v6260_v8, %v6261_v36  ;;  %v5231_v48 = vsub.f32 %v6263_v42, %v4909_v17  ;;  %v6264_v45 = vld [vmem:[#allocation42_spill] sm:$0xff]  ;;  %v6266_v36 = vld [vmem:[#allocation75_spill] sm:$0xff] }
 0x29e   : > { %v2331_v34 = vrot.slane %v2220_v15, %v5102_v50  ;;  %v2335_v63 = vrot.slane %v2223_v59, %v5102_v50  ;;  %v5235_v9 = vsub.f32 %v6264_v45, %v4913_v5  ;;  %v6265_v8 = vld [vmem:[#allocation74_spill] sm:$0xff] }
 0x29f   : > { %2521 = vperm.xlu0 %3527, %v2098_v44  }
 0x2a0   : > { %v2425_v10 = vsel %vm2414_vm3, %v2331_v34, %v2424_v26  ;;  %2802 = vperm.xlu1 %3526, %v6262_v37   ;;  %v6267_v37 = vsub.f32 %v6265_v8, %v6266_v36  ;;  %v2102_v5 = vadd.f32 %v5231_v48, %v5235_v9 }
 0x2a1   : > { %v2226_v32 = vpop.permute.xlu1 %2225  ;;  %v2229_v44 = vpop.permute.xlu0 %2228  ;;  %v2426_v34 = vsel %vm2416_vm4, %v2335_v63, %v2425_v10  ;;  %v6269_v63 = vld [vmem:[#allocation46_spill] sm:$0xff] }
 0x2a2   : > { %v2339_v15 = vrot.slane %v2226_v32, %v5102_v50  ;;  %v2343_v59 = vrot.slane %v2229_v44, %v5102_v50  ;;  %v6268_v32 = vld [vmem:[#allocation45_spill] sm:$0xff]  ;;  %v5253_v10 = vsub.f32 %v6269_v63, %v4933_v58 }
 0x2a3   : > { %2527 = vperm.xlu0 %3527, %v2100_v53   ;;  %v5249_v45 = vsub.f32 %v6268_v32, %v4929_v35  ;;  %v6273_v32 = vld [vmem:[#allocation79_spill] sm:$0xff] }
 0x2a4   : > { %v2427_v26 = vsel %vm2418_vm5, %v2339_v15, %v2426_v34  ;;  %2808 = vperm.xlu1 %3526, %v6267_v37   ;;  %v6270_v34 = vld [vmem:[#allocation76_spill] sm:$0xff] }
 0x2a5   : > { %v2428_v17 = vsel %vm2420_vm6, %v2343_v59, %v2427_v26  ;;  %v2232_v42 = vpop.permute.xlu1 %2231  ;;  %v2235_v53 = vpop.permute.xlu0 %2234  ;;  %v6271_v59 = vld [vmem:[#allocation77_spill] sm:$0xff]  ;;  %v2104_v35 = vadd.f32 %v5249_v45, %v5253_v10 }
 0x2a6   : > { %2449 = vst.msk [vmem:[%s5176_s28 + $0x8] sm:$0xff] %vm2447_vm7, %v2428_v17  ;;  %v2347_v15 = vrot.slane %v2232_v42, %v5102_v50  ;;  %v2351_v44 = vrot.slane %v2235_v53, %v5102_v50  ;;  %v6272_v26 = vsub.f32 %v6270_v34, %v6271_v59  ;;  %v2106_v34 = vadd.f32 %v4952_v43, %v4955_v46 }
 0x2a7   : > { %2533 = vperm.xlu0 %3527, %v2102_v5   ;;  %v6274_v5 = vld [vmem:[#allocation80_spill] sm:$0xff] }
 0x2a8   : > { %2814 = vperm.xlu1 %3526, %v6272_v26   ;;  %v2429_v37 = vsel %vm2408_vm0, %v2351_v44, %v2347_v15  ;;  %v6275_v63 = vsub.f32 %v6273_v32, %v6274_v5  ;;  %v2108_v32 = vadd.f32 %v4978_v2, %v4981_v0  ;;  %v6279_v5 = vld [vmem:[#allocation15_spill] sm:$0xff] }
 0x2a9   : > { %v2238_v8 = vpop.permute.xlu1 %2237  ;;  %v2241_v58 = vpop.permute.xlu0 %2240 }
 0x2aa   : > { %v2355_v36 = vrot.slane %v2238_v8, %v5102_v50  ;;  %v2359_v17 = vrot.slane %v2241_v58, %v5102_v50 }
 0x2ab   : > { %2539 = vperm.xlu0 %3527, %v2104_v35   ;;  %v6277_v35 = vld [vmem:[#allocation84_spill] sm:$0xff] }
 0x2ac   : > { %v2430_v42 = vsel %vm2410_vm1, %v2355_v36, %v2429_v37  ;;  %2820 = vperm.xlu1 %3526, %v6275_v63   ;;  %v6276_v36 = vld [vmem:[#allocation83_spill] sm:$0xff]  ;;  %v5284_v63 = vsub.f32 %v6279_v5, %v5001_v24 }
 0x2ad   : > { %v2244_v53 = vpop.permute.xlu1 %2243  ;;  %v2247_v26 = vpop.permute.xlu0 %2246  ;;  %v2431_v8 = vsel %vm2412_vm2, %v2359_v17, %v2430_v42  ;;  %v6278_v58 = vsub.f32 %v6276_v36, %v6277_v35  ;;  %v6280_v17 = vld [vmem:[#allocation9_spill] sm:$0xff]  ;;  %v6281_v36 = vld [vmem:[#allocation87_spill] sm:$0xff]  ;;  %v6282_v35 = vld [vmem:[#allocation88_spill] sm:$0xff] }
 0x2ae   : > { %v2363_v59 = vrot.slane %v2244_v53, %v5102_v50  ;;  %v2367_v15 = vrot.slane %v2247_v26, %v5102_v50  ;;  %v5288_v42 = vsub.f32 %v6280_v17, %v5005_v11 }
 0x2af   : > { %2545 = vperm.xlu0 %3527, %v2106_v34  }
 0x2b0   : > { %v2432_v44 = vsel %vm2414_vm3, %v2363_v59, %v2431_v8  ;;  %2826 = vperm.xlu1 %3526, %v6278_v58   ;;  %v6283_v58 = vsub.f32 %v6281_v36, %v6282_v35  ;;  %v2110_v11 = vadd.f32 %v5284_v63, %v5288_v42 }
 0x2b1   : > { %v2250_v37 = vpop.permute.xlu1 %2249  ;;  %v2253_v34 = vpop.permute.xlu0 %2252  ;;  %v2433_v59 = vsel %vm2416_vm4, %v2367_v15, %v2432_v44  ;;  %v6285_v15 = vld [vmem:[#allocation13_spill] sm:$0xff] }
 0x2b2   : > { %v2371_v53 = vrot.slane %v2250_v37, %v5102_v50  ;;  %v2375_v26 = vrot.slane %v2253_v34, %v5102_v50  ;;  %v6284_v37 = vld [vmem:[#allocation7_spill] sm:$0xff]  ;;  %v5306_v44 = vsub.f32 %v6285_v15, %v5027_v60 }
 0x2b3   : > { %2551 = vperm.xlu0 %3527, %v2108_v32   ;;  %v5302_v17 = vsub.f32 %v6284_v37, %v5023_v55  ;;  %v6289_v37 = vld [vmem:[#allocation95_spill] sm:$0xff] }
 0x2b4   : > { %v2434_v8 = vsel %vm2418_vm5, %v2371_v53, %v2433_v59  ;;  %2832 = vperm.xlu1 %3526, %v6283_v58   ;;  %v6286_v59 = vld [vmem:[#allocation91_spill] sm:$0xff] }
 0x2b5   : > { %v2435_v24 = vsel %vm2420_vm6, %v2375_v26, %v2434_v8  ;;  %v2256_v5 = vpop.permute.xlu1 %2255  ;;  %v2259_v32 = vpop.permute.xlu0 %2258  ;;  %v6287_v26 = vld [vmem:[#allocation92_spill] sm:$0xff]  ;;  %v2112_v55 = vadd.f32 %v5302_v17, %v5306_v44 }
 0x2b6   : > { %2450 = vst.msk [vmem:[%s5176_s28 + $0x10] sm:$0xff] %vm2447_vm7, %v2435_v24  ;;  %v2379_v53 = vrot.slane %v2256_v5, %v5102_v50  ;;  %v2383_v34 = vrot.slane %v2259_v32, %v5102_v50  ;;  %v6288_v8 = vsub.f32 %v6286_v59, %v6287_v26  ;;  %v2114_v59 = vadd.f32 %v5048_v47, %v5051_v27  ;;  %v6292_v26 = vld [vmem:[#allocation57_spill] sm:$0xff] }
 0x2b7   : > { %2557 = vperm.xlu0 %3527, %v2110_v11   ;;  %v6290_v11 = vld [vmem:[#allocation96_spill] sm:$0xff] }
 0x2b8   : > { %2838 = vperm.xlu1 %3526, %v6288_v8   ;;  %v2436_v58 = vsel %vm2408_vm0, %v2383_v34, %v2379_v53  ;;  %v6291_v15 = vsub.f32 %v6289_v37, %v6290_v11  ;;  %v5328_v8 = vsub.f32 %v6292_v26, %v5071_v41  ;;  %v6294_v37 = vsub.f32 %v4644_v39, %v4647_v61  ;;  %v6295_v26 = vld [vmem:[#allocation97_spill] sm:$0xff] }
 0x2b9   : > { %v2262_v36 = vpop.permute.xlu1 %2261  ;;  %v2265_v60 = vpop.permute.xlu0 %2264  ;;  %v2119_v61 = vsub.f32 %v5111_v16, %v5115_v51  ;;  %v6301_v16 = vld [vmem:[#allocation101_spill] sm:$0xff]  ;;  %v6302_v51 = vld [vmem:[#allocation102_spill] sm:$0xff] }
 0x2ba   : > { %v2387_v35 = vrot.slane %v2262_v36, %v5102_v50  ;;  %v2391_v24 = vrot.slane %v2265_v60, %v5102_v50  ;;  %v6293_v36 = vld [vmem:[#allocation59_spill] sm:$0xff] }
 0x2bb   : > { %2563 = vperm.xlu0 %3527, %v2112_v55   ;;  %v5332_v53 = vsub.f32 %v6293_v36, %v5075_v57 }
 0x2bc   : > { %v2437_v5 = vsel %vm2410_vm1, %v2387_v35, %v2436_v58  ;;  %2844 = vperm.xlu1 %3526, %v6291_v15  }
 0x2bd   : > { %v2268_v32 = vpop.permute.xlu1 %2267  ;;  %v2271_v35 = vpop.permute.xlu0 %2270  ;;  %v2438_v55 = vsel %vm2412_vm2, %v2391_v24, %v2437_v5  ;;  %v2116_v57 = vadd.f32 %v5328_v8, %v5332_v53 }
 0x2be   : > { %v2395_v34 = vrot.slane %v2268_v32, %v5102_v50  ;;  %v2399_v60 = vrot.slane %v2271_v35, %v5102_v50 }
 0x2bf   : > { %2569 = vperm.xlu0 %3527, %v2114_v59   ;;  %v6296_v59 = vld [vmem:[#allocation98_spill] sm:$0xff] }
 0x2c0   : > { %v2439_v58 = vsel %vm2414_vm3, %v2395_v34, %v2438_v55  ;;  %2850 = vperm.xlu1 %3526, %v6294_v37   ;;  %v6297_v36 = vsub.f32 %v6295_v26, %v6296_v59  ;;  %v6298_v55 = vld [vmem:[#allocation99_spill] sm:$0xff]  ;;  %v2122_v37 = vsub.f32 %v5129_v62, %v5133_v29  ;;  %v6305_v29 = vld [vmem:[#allocation104_spill] sm:$0xff]  ;;  %v2126_v26 = vsub.f32 %v5165_v1, %v5169_v19 }
 0x2c1   : > { %v2274_v41 = vpop.permute.xlu1 %2273  ;;  %v2277_v15 = vpop.permute.xlu0 %2276  ;;  %v2440_v32 = vsel %vm2416_vm4, %v2399_v60, %v2439_v58  ;;  %v6299_v60 = vld [vmem:[#allocation100_spill] sm:$0xff]  ;;  %v6304_v62 = vld [vmem:[#allocation103_spill] sm:$0xff]  ;;  %v6309_v1 = vsub.f32 %v4776_v56, %v4779_v12  ;;  %v2130_v19 = vsub.f32 %v5205_v23, %v5209_v13  ;;  %v6311_v56 = vsub.f32 %v4816_v52, %v4819_v30 }
 0x2c2   : > { %v2403_v11 = vrot.slane %v2274_v41, %v5102_v50  ;;  %v2407_v24 = vrot.slane %v2277_v15, %v5102_v50  ;;  %v6300_v58 = vsub.f32 %v6298_v55, %v6299_v60  ;;  %v2124_v15 = vsub.f32 %v5147_v31, %v5151_v14  ;;  %v6307_v31 = vld [vmem:[#allocation107_spill] sm:$0xff] }
 0x2c3   : > { %2575 = vperm.xlu0 %3527, %v2116_v57   ;;  %v6308_v14 = vsub.f32 %v4760_v4, %v6307_v31  ;;  %v6310_v4 = vsub.f32 %v4796_v21, %v4799_v22  ;;  %v2142_v12 = vsub.f32 %v5284_v63, %v5288_v42  ;;  %v6312_v22 = vsub.f32 %v4836_v33, %v4839_v28  ;;  %v6315_v33 = vld [vmem:[#allocation32_spill] sm:$0xff]  ;;  %v6316_v42 = vld [vmem:[#allocation89_spill] sm:$0xff] }
 0x2c4   : > { %v2441_v5 = vsel %vm2418_vm5, %v2403_v11, %v2440_v32  ;;  %2856 = vperm.xlu1 %3526, %v6297_v36   ;;  %v6303_v11 = vsub.f32 %v6301_v16, %v6302_v51  ;;  %v2136_v21 = vsub.f32 %v5249_v45, %v5253_v10  ;;  %v6313_v30 = vsub.f32 %v4856_v3, %v4859_v40  ;;  %v6319_v40 = vld [vmem:[#allocation37_spill] sm:$0xff]  ;;  %v6320_v16 = vld [vmem:[#allocation38_spill] sm:$0xff] }
 0x2c5   : > { %v2442_v39 = vsel %vm2420_vm6, %v2407_v24, %v2441_v5  ;;  %v5355_v34 = vpop.permute.xlu0 %2778  ;;  %v6306_v5 = vsub.f32 %v6304_v62, %v6305_v29  ;;  %v6314_v28 = vsub.f32 %v4938_v38, %v4941_v20  ;;  %v6317_v45 = vsub.f32 %v6315_v33, %v6316_v42  ;;  %v6322_v38 = vld [vmem:[#allocation39_spill] sm:$0xff]  ;;  %v6324_v62 = vld [vmem:[#allocation44_spill] sm:$0xff] }
 0x2c6   : > { %2451 = vst.msk [vmem:[%s5176_s28 + $0x18] sm:$0xff] %vm2447_vm7, %v2442_v39  ;;  %v5357_v35 = vpop.permute.xlu1 %2485  ;;  %v2128_v39 = vsub.f32 %v5188_v25, %v5192_v18  ;;  %v2134_v25 = vsub.f32 %v5231_v48, %v5235_v9  ;;  %v6318_v3 = vsub.f32 %v4952_v43, %v4955_v46  ;;  %v6321_v51 = vsub.f32 %v6319_v40, %v6320_v16  ;;  %v6325_v29 = vld [vmem:[#allocation47_spill] sm:$0xff] }
 0x2c7   : > { %3074 = vperm.xlu0 %3527, %v2119_v61   ;;  %v2144_v43 = vsub.f32 %v5302_v17, %v5306_v44  ;;  %v6327_v31 = vsub.f32 %v4888_v54, %v4891_v49  ;;  %v6331_v44 = vld [vmem:[#allocation40_spill] sm:$0xff]  ;;  %v6332_v49 = vld [vmem:[#allocation43_spill] sm:$0xff]  ;;  %v2583_v33 = vrot.slane %v5357_v35, %v5102_v50 }
 0x2c8   : > { %2862 = vperm.xlu1 %3526, %v6300_v58   ;;  %v6333_v54 = vsub.f32 %v6331_v44, %v6332_v49  ;;  %v6342_v44 = vld [vmem:[#allocation8_spill] sm:$0xff] }
 0x2c9   : > { %v5364_v41 = vpop.permute.xlu0 %2787  ;;  %v6343_v49 = vld [vmem:[#allocation16_spill] sm:$0xff] }
 0x2ca   : > { %v5366_v57 = vpop.permute.xlu1 %2491 }
 0x2cb   : > { %3083 = vperm.xlu0 %3527, %v2122_v37  }
 0x2cc   : > { %2868 = vperm.xlu1 %3526, %v6303_v11  }
 0x2cd   : > { %v5373_v32 = vpop.permute.xlu0 %2793 }
 0x2ce   : > { %v5375_v24 = vpop.permute.xlu1 %2494 }
 0x2cf   : > { %3089 = vperm.xlu0 %3527, %v2124_v15   ;;  %v6323_v15 = vsub.f32 %v4965_v7, %v6322_v38  ;;  %v2148_v7 = vsub.f32 %v5328_v8, %v5332_v53  ;;  %v6334_v8 = vsub.f32 %v5048_v47, %v5051_v27  ;;  %v2591_v27 = vrot.slane %v5366_v57, %v5102_v50  ;;  %v6339_v57 = vld [vmem:[#allocation35_spill] sm:$0xff] }
 0x2d0   : > { %3528 = vset.pattern.permute.xlu1 %v6230_v6  ;;  %v6338_v47 = vsub.f32 %v4978_v2, %v4981_v0  ;;  %v2876_v2 = vrot.slane %v5355_v34, %v5102_v50 }
 0x2d1   : > { %3071 = vperm.xlu1 %3528, %v6306_v5   ;;  %v5383_v59 = vpop.permute.xlu0 %2799  ;;  %v6326_v5 = vsub.f32 %v6324_v62, %v6325_v29  ;;  %v6340_v62 = vld [vmem:[#allocation36_spill] sm:$0xff] }
 0x2d2   : > { %v5385_v36 = vpop.permute.xlu1 %2500  ;;  %v6341_v29 = vsub.f32 %v6339_v57, %v6340_v62 }
 0x2d3   : > { %3095 = vperm.xlu0 %3527, %v2126_v26  }
 0x2d5   : > { %3077 = vperm.xlu1 %3528, %v6308_v14   ;;  %v5392_v6 = vpop.permute.xlu0 %2805 }
 0x2d6   : > { %v5394_v61 = vpop.permute.xlu1 %2506 }
 0x2d7   : > { %3101 = vperm.xlu0 %3527, %v2128_v39  }
 0x2d9   : > { %3080 = vperm.xlu1 %3528, %v6309_v1   ;;  %v5401_v55 = vpop.permute.xlu0 %2811  ;;  %v6328_v1 = vld [vmem:[#allocation48_spill] sm:$0xff] }
 0x2da   : > { %v5403_v60 = vpop.permute.xlu1 %2512 }
 0x2db   : > { %3107 = vperm.xlu0 %3527, %v2130_v19   ;;  %v6329_v19 = vld [vmem:[#allocation49_spill] sm:$0xff] }
 0x2dd   : > { %3086 = vperm.xlu1 %3528, %v6310_v4   ;;  %v5410_v18 = vpop.permute.xlu0 %2817  ;;  %v6330_v4 = vsub.f32 %v6328_v1, %v6329_v19  ;;  %v2888_v1 = vrot.slane %v5364_v41, %v5102_v50  ;;  %v2611_v19 = vrot.slane %v5394_v61, %v5102_v50 }
 0x2de   : > { %v5412_v58 = vpop.permute.xlu1 %2518 }
 0x2df   : > { %3119 = vperm.xlu0 %3527, %v2134_v25  }
 0x2e1   : > { %3092 = vperm.xlu1 %3528, %v6311_v56   ;;  %v5419_v13 = vpop.permute.xlu0 %2823 }
 0x2e2   : > { %v5421_v23 = vpop.permute.xlu1 %2524 }
 0x2e3   : > { %3143 = vperm.xlu0 %3527, %v2142_v12   ;;  %v6335_v12 = vld [vmem:[#allocation50_spill] sm:$0xff] }
 0x2e5   : > { %3098 = vperm.xlu1 %3528, %v6312_v22   ;;  %v5428_v48 = vpop.permute.xlu0 %2829  ;;  %v6336_v22 = vld [vmem:[#allocation12_spill] sm:$0xff] }
 0x2e6   : > { %v5430_v9 = vpop.permute.xlu1 %2530 }
 0x2e7   : > { %3125 = vperm.xlu0 %3527, %v2136_v21   ;;  %v6337_v21 = vsub.f32 %v6335_v12, %v6336_v22 }
 0x2e9   : > { %3104 = vperm.xlu1 %3528, %v6313_v30   ;;  %v5435_v52 = vpop.permute.xlu0 %2835 }
 0x2ea   : > { %v5437_v63 = vpop.permute.xlu1 %2536 }
 0x2eb   : > { %3128 = vperm.xlu0 %3527, %v6314_v28  }
 0x2ed   : > { %3110 = vperm.xlu1 %3528, %v6317_v45   ;;  %v5445_v10 = vpop.permute.xlu0 %2841  ;;  %v2595_v45 = vrot.slane %v5375_v24, %v5102_v50  ;;  %v2603_v24 = vrot.slane %v5385_v36, %v5102_v50  ;;  %v6344_v36 = vsub.f32 %v6342_v44, %v6343_v49 }
 0x2ee   : > { %v5447_v37 = vpop.permute.xlu1 %2542 }
 0x2ef   : > { %3131 = vperm.xlu0 %3527, %v6318_v3  }
 0x2f1   : > { %3122 = vperm.xlu1 %3528, %v6321_v51   ;;  %v5455_v11 = vpop.permute.xlu0 %2847 }
 0x2f2   : > { %v5457_v20 = vpop.permute.xlu1 %2548 }
 0x2f3   : > { %3134 = vperm.xlu0 %3527, %v6323_v15  }
 0x2f5   : > { %3146 = vperm.xlu1 %3528, %v6326_v5   ;;  %v5465_v26 = vpop.permute.xlu0 %2853 }
 0x2f6   : > { %v5467_v46 = vpop.permute.xlu1 %2554 }
 0x2f7   : > { %3113 = vperm.xlu0 %3527, %v6327_v31  }
 0x2f9   : > { %3149 = vperm.xlu1 %3528, %v2144_v43   ;;  %v5476_v14 = vpop.permute.xlu0 %2859 }
 0x2fa   : > { %v5478_v39 = vpop.permute.xlu1 %2560 }
 0x2fb   : > { %3161 = vperm.xlu0 %3527, %v2148_v7  }
 0x2fd   : > { %3152 = vperm.xlu1 %3528, %v6330_v4   ;;  %v5483_v25 = vpop.permute.xlu0 %2865 }
 0x2fe   : > { %v5485_v17 = vpop.permute.xlu1 %2566 }
 0x2ff   : > { %3140 = vperm.xlu0 %3527, %v6333_v54  }
 0x301   : > { %3155 = vperm.xlu1 %3528, %v6334_v8   ;;  %v5493_v53 = vpop.permute.xlu0 %2871 }
 0x302   : > { %v5495_v56 = vpop.permute.xlu1 %2572 }
 0x305   : > { %3158 = vperm.xlu1 %3528, %v6337_v21  }
 0x306   : > { %v5500_v30 = vpop.permute.xlu1 %2578  ;;  %v2489_v28 = vpop.permute.xlu0 %2488 }
 0x307   : > { %v2587_v42 = vrot.slane %v2489_v28, %v5102_v50  ;;  %v2896_v28 = vrot.slane %v5373_v32, %v5102_v50 }
 0x309   : > { %3137 = vperm.xlu1 %3528, %v6338_v47   ;;  %v2708_v3 = vsel %vm2408_vm0, %v2587_v42, %v2583_v33 }
 0x30a   : > { %v2709_v40 = vsel %vm2410_vm1, %v2591_v27, %v2708_v3  ;;  %v2498_v16 = vpop.permute.xlu0 %2497  ;;  %v2619_v27 = vrot.slane %v5403_v60, %v5102_v50  ;;  %v2627_v60 = vrot.slane %v5412_v58, %v5102_v50  ;;  %v2635_v58 = vrot.slane %v5421_v23, %v5102_v50 }
 0x30b   : > { %v2782_v51 = vpop.permute.xlu1 %2781  ;;  %v2710_v35 = vsel %vm2412_vm2, %v2595_v45, %v2709_v40  ;;  %v2599_v38 = vrot.slane %v2498_v16, %v5102_v50 }
 0x30c   : > { %v2880_v15 = vrot.slane %v2782_v51, %v5102_v50  ;;  %v2904_v51 = vrot.slane %v5383_v59, %v5102_v50 }
 0x30d   : > { %3116 = vperm.xlu1 %3528, %v6341_v29   ;;  %v2711_v0 = vsel %vm2414_vm3, %v2599_v38, %v2710_v35 }
 0x30e   : > { %v2504_v5 = vpop.permute.xlu0 %2503  ;;  %v3001_v4 = vsel %vm2408_vm0, %v2880_v15, %v2876_v2  ;;  %v2712_v34 = vsel %vm2416_vm4, %v2603_v24, %v2711_v0  ;;  %v2912_v24 = vrot.slane %v5392_v6, %v5102_v50 }
 0x30f   : > { %v2785_v43 = vpop.permute.xlu1 %2784  ;;  %v2607_v31 = vrot.slane %v2504_v5, %v5102_v50 }
 0x310   : > { %v2884_v7 = vrot.slane %v2785_v43, %v5102_v50 }
 0x311   : > { %3164 = vperm.xlu1 %3528, %v6344_v36   ;;  %v2713_v54 = vsel %vm2418_vm5, %v2607_v31, %v2712_v34 }
 0x312   : > { %v3002_v8 = vsel %vm2410_vm1, %v2884_v7, %v3001_v4  ;;  %v2714_v12 = vsel %vm2420_vm6, %v2611_v19, %v2713_v54  ;;  %v2510_v22 = vpop.permute.xlu0 %2509  ;;  %v2643_v19 = vrot.slane %v5430_v9, %v5102_v50  ;;  %v2928_v9 = vrot.slane %v5410_v18, %v5102_v50 }
 0x313   : > { %v2791_v21 = vpop.permute.xlu1 %2790  ;;  %v3003_v41 = vsel %vm2412_vm2, %v2888_v1, %v3002_v8  ;;  %3437 = vst.msk [vmem:[%s5176_s28 + $0x20] sm:$0xff] %vm2447_vm7, %v2714_v12  ;;  %v2615_v33 = vrot.slane %v2510_v22, %v5102_v50  ;;  %v2920_v1 = vrot.slane %v5401_v55, %v5102_v50  ;;  %v2651_v22 = vrot.slane %v5437_v63, %v5102_v50 }
 0x314   : > { %v2892_v61 = vrot.slane %v2791_v21, %v5102_v50  ;;  %v2659_v63 = vrot.slane %v5447_v37, %v5102_v50  ;;  %v2667_v37 = vrot.slane %v5457_v20, %v5102_v50 }
 0x315   : > { %v2715_v32 = vsel %vm2408_vm0, %v2619_v27, %v2615_v33 }
 0x316   : > { %v3004_v42 = vsel %vm2414_vm3, %v2892_v61, %v3003_v41  ;;  %v2516_v47 = vpop.permute.xlu0 %2515 }
 0x317   : > { %v2797_v45 = vpop.permute.xlu1 %2796  ;;  %v3005_v3 = vsel %vm2416_vm4, %v2896_v28, %v3004_v42  ;;  %v2623_v40 = vrot.slane %v2516_v47, %v5102_v50  ;;  %v2936_v42 = vrot.slane %v5419_v13, %v5102_v50 }
 0x318   : > { %v2900_v16 = vrot.slane %v2797_v45, %v5102_v50 }
 0x319   : > { %v2716_v35 = vsel %vm2410_vm1, %v2623_v40, %v2715_v32 }
 0x31a   : > { %v3006_v38 = vsel %vm2418_vm5, %v2900_v16, %v3005_v3  ;;  %v2522_v57 = vpop.permute.xlu0 %2521  ;;  %v2717_v0 = vsel %vm2412_vm2, %v2627_v60, %v2716_v35  ;;  %v2944_v35 = vrot.slane %v5428_v48, %v5102_v50 }
 0x31b   : > { %v3007_v15 = vsel %vm2420_vm6, %v2904_v51, %v3006_v38  ;;  %v2803_v62 = vpop.permute.xlu1 %2802  ;;  %v2631_v29 = vrot.slane %v2522_v57, %v5102_v50 }
 0x31c   : > { %3441 = vst.msk [vmem:[%s5176_s28 + $0x40] sm:$0xff] %vm2447_vm7, %v3007_v15  ;;  %v2908_v59 = vrot.slane %v2803_v62, %v5102_v50  ;;  %v2952_v62 = vrot.slane %v5435_v52, %v5102_v50 }
 0x31d   : > { %v2718_v2 = vsel %vm2414_vm3, %v2631_v29, %v2717_v0  ;;  %v2675_v29 = vrot.slane %v5467_v46, %v5102_v50  ;;  %v2960_v46 = vrot.slane %v5445_v10, %v5102_v50 }
 0x31e   : > { %v2528_v5 = vpop.permute.xlu0 %2527  ;;  %v3008_v4 = vsel %vm2408_vm0, %v2912_v24, %v2908_v59  ;;  %v2719_v6 = vsel %vm2416_vm4, %v2635_v58, %v2718_v2 }
 0x31f   : > { %v2809_v43 = vpop.permute.xlu1 %2808  ;;  %v2639_v31 = vrot.slane %v2528_v5, %v5102_v50 }
 0x320   : > { %v2916_v7 = vrot.slane %v2809_v43, %v5102_v50 }
 0x321   : > { %v2720_v34 = vsel %vm2418_vm5, %v2639_v31, %v2719_v6 }
 0x322   : > { %v3009_v23 = vsel %vm2410_vm1, %v2916_v7, %v3008_v4  ;;  %v2721_v44 = vsel %vm2420_vm6, %v2643_v19, %v2720_v34  ;;  %v2534_v49 = vpop.permute.xlu0 %2533  ;;  %v2683_v7 = vrot.slane %v5478_v39, %v5102_v50  ;;  %v2691_v39 = vrot.slane %v5485_v17, %v5102_v50 }
 0x323   : > { %v2815_v36 = vpop.permute.xlu1 %2814  ;;  %v3010_v54 = vsel %vm2412_vm2, %v2920_v1, %v3009_v23  ;;  %3438 = vst.msk [vmem:[%s5176_s28 + $0x28] sm:$0xff] %vm2447_vm7, %v2721_v44  ;;  %v2647_v8 = vrot.slane %v2534_v49, %v5102_v50  ;;  %v2968_v23 = vrot.slane %v5455_v11, %v5102_v50  ;;  %v2699_v17 = vrot.slane %v5495_v56, %v5102_v50 }
 0x324   : > { %v2924_v55 = vrot.slane %v2815_v36, %v5102_v50 }
 0x325   : > { %v2722_v18 = vsel %vm2408_vm0, %v2651_v22, %v2647_v8  ;;  %v2976_v22 = vrot.slane %v5465_v26, %v5102_v50 }
 0x326   : > { %v3011_v12 = vsel %vm2414_vm3, %v2924_v55, %v3010_v54  ;;  %v2540_v21 = vpop.permute.xlu0 %2539 }
 0x327   : > { %v2821_v41 = vpop.permute.xlu1 %2820  ;;  %v3012_v61 = vsel %vm2416_vm4, %v2928_v9, %v3011_v12  ;;  %v2655_v28 = vrot.slane %v2540_v21, %v5102_v50 }
 0x328   : > { %v2932_v33 = vrot.slane %v2821_v41, %v5102_v50 }
 0x329   : > { %v2723_v27 = vsel %vm2410_vm1, %v2655_v28, %v2722_v18 }
 0x32a   : > { %v3013_v47 = vsel %vm2418_vm5, %v2932_v33, %v3012_v61  ;;  %v2546_v3 = vpop.permute.xlu0 %2545  ;;  %v2724_v51 = vsel %vm2412_vm2, %v2659_v63, %v2723_v27  ;;  %v2984_v33 = vrot.slane %v5476_v14, %v5102_v50 }
 0x32b   : > { %v3014_v45 = vsel %vm2420_vm6, %v2936_v42, %v3013_v47  ;;  %v2827_v40 = vpop.permute.xlu1 %2826  ;;  %v2663_v16 = vrot.slane %v2546_v3, %v5102_v50  ;;  %v2707_v42 = vrot.slane %v5500_v30, %v5102_v50  ;;  %v2992_v30 = vrot.slane %v5483_v25, %v5102_v50 }
 0x32c   : > { %3442 = vst.msk [vmem:[%s5176_s28 + $0x48] sm:$0xff] %vm2447_vm7, %v3014_v45  ;;  %v2940_v13 = vrot.slane %v2827_v40, %v5102_v50 }
 0x32d   : > { %v2725_v32 = vsel %vm2414_vm3, %v2663_v16, %v2724_v51 }
 0x32e   : > { %v2552_v38 = vpop.permute.xlu0 %2551  ;;  %v3015_v0 = vsel %vm2408_vm0, %v2944_v35, %v2940_v13  ;;  %v2726_v48 = vsel %vm2416_vm4, %v2667_v37, %v2725_v32  ;;  %v3000_v35 = vrot.slane %v5493_v53, %v5102_v50 }
 0x32f   : > { %v2833_v60 = vpop.permute.xlu1 %2832  ;;  %v2671_v15 = vrot.slane %v2552_v38, %v5102_v50 }
 0x330   : > { %v2948_v57 = vrot.slane %v2833_v60, %v5102_v50 }
 0x331   : > { %v2727_v59 = vsel %vm2418_vm5, %v2671_v15, %v2726_v48 }
 0x332   : > { %v3016_v20 = vsel %vm2410_vm1, %v2948_v57, %v3015_v0  ;;  %v2728_v2 = vsel %vm2420_vm6, %v2675_v29, %v2727_v59  ;;  %v2558_v24 = vpop.permute.xlu0 %2557 }
 0x333   : > { %v2839_v58 = vpop.permute.xlu1 %2838  ;;  %v3017_v5 = vsel %vm2412_vm2, %v2952_v62, %v3016_v20  ;;  %3439 = vst.msk [vmem:[%s5176_s28 + $0x30] sm:$0xff] %vm2447_vm7, %v2728_v2  ;;  %v2679_v43 = vrot.slane %v2558_v24, %v5102_v50 }
 0x334   : > { %v2956_v52 = vrot.slane %v2839_v58, %v5102_v50 }
 0x335   : > { %v2729_v10 = vsel %vm2408_vm0, %v2683_v7, %v2679_v43 }
 0x336   : > { %v3018_v31 = vsel %vm2414_vm3, %v2956_v52, %v3017_v5  ;;  %v2564_v1 = vpop.permute.xlu0 %2563 }
 0x337   : > { %v2845_v19 = vpop.permute.xlu1 %2844  ;;  %v3019_v4 = vsel %vm2416_vm4, %v2960_v46, %v3018_v31  ;;  %v2687_v6 = vrot.slane %v2564_v1, %v5102_v50 }
 0x338   : > { %v2964_v34 = vrot.slane %v2845_v19, %v5102_v50 }
 0x339   : > { %v2730_v44 = vsel %vm2410_vm1, %v2687_v6, %v2729_v10 }
 0x33a   : > { %v3020_v49 = vsel %vm2418_vm5, %v2964_v34, %v3019_v4  ;;  %v2570_v54 = vpop.permute.xlu0 %2569  ;;  %v2731_v8 = vsel %vm2412_vm2, %v2691_v39, %v2730_v44 }
 0x33b   : > { %v3021_v36 = vsel %vm2420_vm6, %v2968_v23, %v3020_v49  ;;  %v2851_v55 = vpop.permute.xlu1 %2850  ;;  %v2695_v9 = vrot.slane %v2570_v54, %v5102_v50 }
 0x33c   : > { %3443 = vst.msk [vmem:[%s5176_s28 + $0x50] sm:$0xff] %vm2447_vm7, %v3021_v36  ;;  %v2972_v11 = vrot.slane %v2851_v55, %v5102_v50 }
 0x33d   : > { %v2732_v12 = vsel %vm2414_vm3, %v2695_v9, %v2731_v8 }
 0x33e   : > { %v2576_v21 = vpop.permute.xlu0 %2575  ;;  %v3022_v18 = vsel %vm2408_vm0, %v2976_v22, %v2972_v11  ;;  %v2733_v26 = vsel %vm2416_vm4, %v2699_v17, %v2732_v12 }
 0x33f   : > { %v2857_v41 = vpop.permute.xlu1 %2856  ;;  %v2703_v61 = vrot.slane %v2576_v21, %v5102_v50 }
 0x340   : > { %v2980_v28 = vrot.slane %v2857_v41, %v5102_v50 }
 0x341   : > { %v2734_v27 = vsel %vm2418_vm5, %v2703_v61, %v2733_v26 }
 0x342   : > { %v3023_v56 = vsel %vm2410_vm1, %v2980_v28, %v3022_v18  ;;  %v2735_v47 = vsel %vm2420_vm6, %v2707_v42, %v2734_v27  ;;  %v3075_v63 = vpop.permute.xlu0 %3074 }
 0x343   : > { %v2863_v45 = vpop.permute.xlu1 %2862  ;;  %v3024_v3 = vsel %vm2412_vm2, %v2984_v33, %v3023_v56  ;;  %3440 = vst.msk [vmem:[%s5176_s28 + $0x38] sm:$0xff] %vm2447_vm7, %v2735_v47  ;;  %v3173_v0 = vrot.slane %v3075_v63, %v5102_v50 }
 0x344   : > { %v2988_v14 = vrot.slane %v2863_v45, %v5102_v50 }
 0x346   : > { %v3025_v40 = vsel %vm2414_vm3, %v2988_v14, %v3024_v3  ;;  %v3084_v16 = vpop.permute.xlu0 %3083 }
 0x347   : > { %v2869_v51 = vpop.permute.xlu1 %2868  ;;  %v3026_v13 = vsel %vm2416_vm4, %v2992_v30, %v3025_v40  ;;  %v3185_v5 = vrot.slane %v3084_v16, %v5102_v50 }
 0x348   : > { %v2996_v32 = vrot.slane %v2869_v51, %v5102_v50 }
 0x34a   : > { %v3027_v37 = vsel %vm2418_vm5, %v2996_v32, %v3026_v13  ;;  %v3090_v60 = vpop.permute.xlu0 %3089 }
 0x34b   : > { %v3028_v38 = vsel %vm2420_vm6, %v3000_v35, %v3027_v37  ;;  %v3193_v1 = vrot.slane %v3090_v60, %v5102_v50 }
 0x34c   : > { %3444 = vst.msk [vmem:[%s5176_s28 + $0x58] sm:$0xff] %vm2447_vm7, %v3028_v38  ;;  %v3072_v15 = vpop.permute.xlu1 %3071 }
 0x34d   : > { %v3169_v62 = vrot.slane %v3072_v15, %v5102_v50 }
 0x34e   : > { %v3096_v25 = vpop.permute.xlu0 %3095 }
 0x34f   : > { %v3294_v53 = vsel %vm2408_vm0, %v3173_v0, %v3169_v62  ;;  %v3201_v27 = vrot.slane %v3096_v25, %v5102_v50 }
 0x350   : > { %v3078_v57 = vpop.permute.xlu1 %3077 }
 0x351   : > { %v3177_v29 = vrot.slane %v3078_v57, %v5102_v50 }
 0x352   : > { %v3102_v48 = vpop.permute.xlu0 %3101 }
 0x353   : > { %v3295_v2 = vsel %vm2410_vm1, %v3177_v29, %v3294_v53  ;;  %v3209_v14 = vrot.slane %v3102_v48, %v5102_v50 }
 0x354   : > { %v3081_v59 = vpop.permute.xlu1 %3080 }
 0x355   : > { %v3181_v20 = vrot.slane %v3081_v59, %v5102_v50 }
 0x356   : > { %v5687_v58 = vpop.permute.xlu0 %3107 }
 0x357   : > { %v3296_v24 = vsel %vm2412_vm2, %v3181_v20, %v3295_v2  ;;  %v3217_v30 = vrot.slane %v5687_v58, %v5102_v50 }
 0x358   : > { %v3087_v52 = vpop.permute.xlu1 %3086  ;;  %v3297_v43 = vsel %vm2414_vm3, %v3185_v5, %v3296_v24 }
 0x359   : > { %v3189_v46 = vrot.slane %v3087_v52, %v5102_v50 }
 0x35a   : > { %v3120_v7 = vpop.permute.xlu0 %3119 }
 0x35b   : > { %v3298_v31 = vsel %vm2416_vm4, %v3189_v46, %v3297_v43  ;;  %v3233_v17 = vrot.slane %v3120_v7, %v5102_v50 }
 0x35c   : > { %v3093_v19 = vpop.permute.xlu1 %3092  ;;  %v3299_v6 = vsel %vm2418_vm5, %v3193_v1, %v3298_v31 }
 0x35d   : > { %v3197_v4 = vrot.slane %v3093_v19, %v5102_v50 }
 0x35e   : > { %v3144_v23 = vpop.permute.xlu0 %3143 }
 0x35f   : > { %v3300_v34 = vsel %vm2420_vm6, %v3197_v4, %v3299_v6  ;;  %v3265_v13 = vrot.slane %v3144_v23, %v5102_v50 }
 0x360   : > { %3445 = vst.msk [vmem:[%s5176_s28 + $0x60] sm:$0xff] %vm2447_vm7, %v3300_v34  ;;  %v3099_v10 = vpop.permute.xlu1 %3098 }
 0x361   : > { %v3205_v33 = vrot.slane %v3099_v10, %v5102_v50 }
 0x362   : > { %v3126_v44 = vpop.permute.xlu0 %3125 }
 0x363   : > { %v3241_v61 = vrot.slane %v3126_v44, %v5102_v50  ;;  %v3301_v63 = vsel %vm2408_vm0, %v3205_v33, %v3201_v27 }
 0x364   : > { %v3105_v49 = vpop.permute.xlu1 %3104  ;;  %v3302_v32 = vsel %vm2410_vm1, %v3209_v14, %v3301_v63 }
 0x365   : > { %v3213_v45 = vrot.slane %v3105_v49, %v5102_v50 }
 0x366   : > { %v3129_v39 = vpop.permute.xlu0 %3128 }
 0x367   : > { %v3245_v26 = vrot.slane %v3129_v39, %v5102_v50  ;;  %v3303_v60 = vsel %vm2412_vm2, %v3213_v45, %v3302_v32 }
 0x368   : > { %v3111_v36 = vpop.permute.xlu1 %3110  ;;  %v3304_v2 = vsel %vm2414_vm3, %v3217_v30, %v3303_v60 }
 0x369   : > { %v3221_v15 = vrot.slane %v3111_v36, %v5102_v50 }
 0x36a   : > { %v3132_v54 = vpop.permute.xlu0 %3131 }
 0x36b   : > { %v3249_v3 = vrot.slane %v3132_v54, %v5102_v50  ;;  %v3305_v52 = vsel %vm2416_vm4, %v3221_v15, %v3304_v2 }
 0x36c   : > { %v3123_v55 = vpop.permute.xlu1 %3122 }
 0x36d   : > { %v3237_v12 = vrot.slane %v3123_v55, %v5102_v50 }
 0x36e   : > { %v3135_v8 = vpop.permute.xlu0 %3134 }
 0x36f   : > { %v3308_v41 = vsel %vm2408_vm0, %v3237_v12, %v3233_v17  ;;  %v3253_v35 = vrot.slane %v3135_v8, %v5102_v50 }
 0x370   : > { %v3147_v9 = vpop.permute.xlu1 %3146  ;;  %v3309_v42 = vsel %vm2410_vm1, %v3241_v61, %v3308_v41 }
 0x371   : > { %v3310_v56 = vsel %vm2412_vm2, %v3245_v26, %v3309_v42  ;;  %v3269_v16 = vrot.slane %v3147_v9, %v5102_v50 }
 0x372   : > { %v3114_v22 = vpop.permute.xlu0 %3113  ;;  %v3311_v40 = vsel %vm2414_vm3, %v3249_v3, %v3310_v56 }
 0x373   : > { %v3312_v62 = vsel %vm2416_vm4, %v3253_v35, %v3311_v40  ;;  %v3225_v29 = vrot.slane %v3114_v22, %v5102_v50  ;;  %v3315_v59 = vsel %vm2408_vm0, %v3269_v16, %v3265_v13 }
 0x374   : > { %v3150_v11 = vpop.permute.xlu1 %3149 }
 0x375   : > { %v3273_v37 = vrot.slane %v3150_v11, %v5102_v50  ;;  %v3306_v31 = vsel %vm2418_vm5, %v3225_v29, %v3305_v52 }
 0x376   : > { %v3162_v18 = vpop.permute.xlu0 %3161 }
 0x377   : > { %v3316_v24 = vsel %vm2410_vm1, %v3273_v37, %v3315_v59  ;;  %v3289_v4 = vrot.slane %v3162_v18, %v5102_v50 }
 0x378   : > { %v3153_v21 = vpop.permute.xlu1 %3152 }
 0x379   : > { %v3277_v25 = vrot.slane %v3153_v21, %v5102_v50 }
 0x37a   : > { %v3141_v51 = vpop.permute.xlu0 %3140 }
 0x37b   : > { %v3261_v0 = vrot.slane %v3141_v51, %v5102_v50  ;;  %v3317_v46 = vsel %vm2412_vm2, %v3277_v25, %v3316_v24 }
 0x37c   : > { %v3156_v28 = vpop.permute.xlu1 %3155 }
 0x37d   : > { %v3281_v48 = vrot.slane %v3156_v28, %v5102_v50 }
 0x37f   : > { %v3318_v7 = vsel %vm2414_vm3, %v3281_v48, %v3317_v46 }
 0x380   : > { %v3159_v47 = vpop.permute.xlu1 %3158 }
 0x381   : > { %v3285_v53 = vrot.slane %v3159_v47, %v5102_v50 }
 0x383   : > { %v3319_v1 = vsel %vm2416_vm4, %v3285_v53, %v3318_v7 }
 0x384   : > { %v3138_v38 = vpop.permute.xlu1 %3137  ;;  %v3320_v23 = vsel %vm2418_vm5, %v3289_v4, %v3319_v1 }
 0x385   : > { %v3257_v57 = vrot.slane %v3138_v38, %v5102_v50 }
 0x387   : > { %v3313_v20 = vsel %vm2418_vm5, %v3257_v57, %v3312_v62 }
 0x388   : > { %v3314_v58 = vsel %vm2420_vm6, %v3261_v0, %v3313_v20  ;;  %v3117_v5 = vpop.permute.xlu1 %3116 }
 0x389   : > { %3447 = vst.msk [vmem:[%s5176_s28 + $0x70] sm:$0xff] %vm2447_vm7, %v3314_v58  ;;  %v3229_v43 = vrot.slane %v3117_v5, %v5102_v50 }
 0x38b   : > { %v3307_v19 = vsel %vm2420_vm6, %v3229_v43, %v3306_v31 }
 0x38c   : > { %3446 = vst.msk [vmem:[%s5176_s28 + $0x68] sm:$0xff] %vm2447_vm7, %v3307_v19  ;;  %v3165_v6 = vpop.permute.xlu1 %3164 }
 0x38d   : > { %v3293_v34 = vrot.slane %v3165_v6, %v5102_v50 }
 0x38f   : > { %v3321_v10 = vsel %vm2420_vm6, %v3293_v34, %v3320_v23 }
 0x390   : > { %3448 = vst.msk [vmem:[%s5176_s28 + $0x78] sm:$0xff] %vm2447_vm7, %v3321_v10 }
 0x391 PF: > { %s14_s11 = sadd.s32 1, %s3607_s11   ;;  %s6345_s6 = smov %s3591_s7 }
 0x392   : > { %p11_p8 = scmp.ge.s32.totalorder %s14_s11, 4   ;;  %s6346_s7 = smov %s3595_s8 }
 0x393   : > { %s6347_s8 = smov %s3684_s18  ;;  %s6348_s9 = smov %s3603_s10 }
 0x394   : > { %s6349_s10 = smov %s6351_s13  ;;  %13 = sbr.rel (!%p11_p8) target bundleno = 4 (0x4), region = 67 }
 0x399   :  { %3361 = vsyncpa [#allocation3], 1 }
 0x39a   :  { %3363 = vsyncpa [#allocation3 + $0x1], 1 }

</bundles_post_ra>
